<compile_context>
chip_gen: v6e
topology: v6e:2x2x1
jax: 0.10.0
libtpu: 0.0.40
codegen_flags: <defaults>
</compile_context>

<pallas_src>
import functools
import numpy as np
import jax
import jax.numpy as jnp
from jax import lax
from jax.experimental import pallas as pl
from jax.experimental.pallas import tpu as pltpu

CONTEXT_SIZE = 16   # final output channels
NUM_CLASSES = 5
EMBED_DIM = 7       # becomes the spatial width W after the Rearrange
HIDDEN_DIM = 32
BN_EPS = 1e-5

W_PAD = 8           # width padded 7 -> 8 for lane alignment
NC_PAD = 8          # class count padded 5 -> 8 (per one-hot segment)
BIAS_COL = 3 * NC_PAD          # one-hot column 24 selects the folded conv bias row
MAX_SINGLE_TILE = 1024         # single-pass fast path limit / row tile for big inputs

HP = lax.Precision.HIGHEST     # only for the tiny BN-finalize dots and the reference


def _round_up(n, m):
    return ((n + m - 1) // m) * m


# --------------------------------------------------------------------------------------
# Kernel helpers
# --------------------------------------------------------------------------------------
def _front_half(xsh_ref, m32_ref, bd2_ref, b2row):
    """Embedding+Linear+ReLU (folded table) + 3x3 conv + bias + ReLU + 1x1 conv 32->32.

    Returns (h2, valid): h2 is (TM, 256) f32 (width-major x channel), valid is a
    (TM, 1) f32 mask that is 0 for padded rows.  Heavy matmuls use bf16 operands with
    f32 accumulation (native MXU path).
    """
    x3 = xsh_ref[...]                                           # (TM, 4) int32
    tm = x3.shape[0]
    col = lax.broadcasted_iota(jnp.int32, (tm, 4 * NC_PAD), 1)  # (TM, 32)
    # One-hot over [up(0..7) | mid(8..15) | dn(16..23) | bias(24) | unused(25..31)].
    # The wrapper pre-shifts the three neighbour class indices into disjoint ranges;
    # -1 marks the conv's zero padding and matches no column (-> zero contribution).
    hit = ((col == x3[:, 0:1]) | (col == x3[:, 1:2]) |
           (col == x3[:, 2:3]) | (col == BIAS_COL))
    onehot = hit.astype(jnp.float32).astype(jnp.bfloat16)       # exact 0/1 in bf16
    h1 = jnp.maximum(
        jnp.dot(onehot, m32_ref[...], preferred_element_type=jnp.float32), 0.0)
    h2 = jnp.dot(h1.astype(jnp.bfloat16), bd2_ref[...],
                 preferred_element_type=jnp.float32) + b2row
    valid = (x3[:, 1:2] >= 0).astype(jnp.float32)               # (TM, 1)
    return h2, valid


def _rowgroup_partials(x):
    """(TM, C) -> (8, C): sum of 8-row groups via aligned static slices + VPU adds
    (tree-shaped).  The expensive 8->1 cross-sublane reduce happens once, outside."""
    tm = x.shape[0]
    parts = [x[g * 8:(g + 1) * 8, :] for g in range(tm // 8)]
    while len(parts) > 1:
        nxt = [a + b for a, b in zip(parts[0::2], parts[1::2])]
        if len(parts) % 2:
            nxt.append(parts[-1])
        parts = nxt
    return parts[0]


# --------------------------------------------------------------------------------------
# Kernels
# --------------------------------------------------------------------------------------
def _single_pass_kernel(xsh_ref, m32_ref, bd2_ref, bd3_ref, vec_ref, g_ref, gt_ref,
                        o_ref, *, inv_n, bn_eps):
    """Whole forward in one grid step (inputs that fit a single row tile)."""
    h2, valid = _front_half(xsh_ref, m32_ref, bd2_ref, vec_ref[0:1, :])
    h2v = h2 * valid
    colsum = jnp.sum(h2v, axis=0, keepdims=True)                 # (1, 256)
    colsum2 = jnp.sum(h2v * h2, axis=0, keepdims=True)
    # Pool the 7 real width positions per channel, expand back to 256 lanes.
    mean_c = jnp.dot(colsum, g_ref[...], precision=HP,
                     preferred_element_type=jnp.float32) * inv_n  # (1, 32)
    ex2_c = jnp.dot(colsum2, g_ref[...], precision=HP,
                    preferred_element_type=jnp.float32) * inv_n
    mean = jnp.dot(mean_c, gt_ref[...], precision=HP,
                   preferred_element_type=jnp.float32)            # (1, 256)
    ex2 = jnp.dot(ex2_c, gt_ref[...], precision=HP,
                  preferred_element_type=jnp.float32)
    var = ex2 - mean * mean                                       # biased, like torch
    scale = vec_ref[1:2, :] * lax.rsqrt(var + bn_eps)             # gamma * rsqrt(var+eps)
    shift = vec_ref[2:3, :] - mean * scale                        # beta - mean*scale
    h_bn = jnp.maximum(h2 * scale + shift, 0.0)
    out = jnp.dot(h_bn.astype(jnp.bfloat16), bd3_ref[...],
                  preferred_element_type=jnp.float32) + vec_ref[3:4, 0:W_PAD * CONTEXT_SIZE]
    o_ref[...] = jnp.maximum(out, 0.0)                            # (TM, 128)


def _stats_kernel(xsh_ref, m32_ref, bd2_ref, vec_ref, o_ref):
    """Pass 1 (multi-tile): per-tile (8, 512) BatchNorm partials [colsum | colsum^2]."""
    cw = W_PAD * HIDDEN_DIM
    h2, valid = _front_half(xsh_ref, m32_ref, bd2_ref, vec_ref[0:1, :])
    h2v = h2 * valid
    o_ref[:, 0:cw] = _rowgroup_partials(h2v)
    o_ref[:, cw:2 * cw] = _rowgroup_partials(h2v * h2)


def _emit_kernel(xsh_ref, m32_ref, bd2_ref, bd3_ref, vec_ref, o_ref):
    """Pass 2 (multi-tile): recompute front half, apply BN scale/shift, final 1x1 conv."""
    h2, _ = _front_half(xsh_ref, m32_ref, bd2_ref, vec_ref[0:1, :])
    h_bn = jnp.maximum(h2 * vec_ref[1:2, :] + vec_ref[2:3, :], 0.0)
    out = jnp.dot(h_bn.astype(jnp.bfloat16), bd3_ref[...],
                  preferred_element_type=jnp.float32) + vec_ref[3:4, 0:W_PAD * CONTEXT_SIZE]
    o_ref[...] = jnp.maximum(out, 0.0)


# --------------------------------------------------------------------------------------
# Parameter generation + packing (shape-independent; done once per set of params)
# --------------------------------------------------------------------------------------
def make_params(key):
    ks = jax.random.split(key, 11)
    p = {}
    p["emb"] = jax.random.normal(ks[0], (NUM_CLASSES, EMBED_DIM), jnp.float32)
    p["wl"] = jax.random.normal(ks[1], (EMBED_DIM, EMBED_DIM), jnp.float32) / np.sqrt(EMBED_DIM)
    p["bl"] = 0.1 * jax.random.normal(ks[2], (EMBED_DIM,), jnp.float32)
    p["w3"] = jax.random.normal(ks[3], (HIDDEN_DIM, 1, 3, 3), jnp.float32) / 3.0
    p["b3"] = 0.1 * jax.random.normal(ks[4], (HIDDEN_DIM,), jnp.float32)
    p["w2"] = jax.random.normal(ks[5], (HIDDEN_DIM, HIDDEN_DIM, 1, 1), jnp.float32) / np.sqrt(HIDDEN_DIM)
    p["b2"] = 0.1 * jax.random.normal(ks[6], (HIDDEN_DIM,), jnp.float32)
    p["gamma"] = 1.0 + 0.1 * jax.random.normal(ks[7], (HIDDEN_DIM,), jnp.float32)
    p["beta"] = 0.1 * jax.random.normal(ks[8], (HIDDEN_DIM,), jnp.float32)
    p["wc"] = jax.random.normal(ks[9], (CONTEXT_SIZE, HIDDEN_DIM, 1, 1), jnp.float32) / np.sqrt(HIDDEN_DIM)
    p["bc"] = 0.1 * jax.random.normal(ks[10], (CONTEXT_SIZE,), jnp.float32)
    return p


def pack_params(params):
    W, WP, CH, CTX, NC, NCP = EMBED_DIM, W_PAD, HIDDEN_DIM, CONTEXT_SIZE, NUM_CLASSES, NC_PAD

    # Embedding + Linear + bias + ReLU folded into one per-class lookup table
    # (a one-hot selects a single row, so ReLU commutes with the selection).
    emb = np.asarray(params["emb"], np.float32)
    wl = np.asarray(params["wl"], np.float32)
    bl = np.asarray(params["bl"], np.float32)
    table = np.maximum(emb @ wl.T + bl[None, :], 0.0)             # (5, 7)
    table_p = np.zeros((NCP, WP), np.float32)
    table_p[:NC, :W] = table

    # 3x3 conv (1->32, padding=1) as a matrix over the three row taps:
    # M24[dy*8 + m, j*CH + oc] = w3[oc, 0, dy, dx] with m = j + dx - 1 in [0, 7).
    w3 = np.asarray(params["w3"], np.float32)
    M24 = np.zeros((3 * WP, WP * CH), np.float32)
    for dy in range(3):
        for dx in range(3):
            for j in range(W):
                m = j + dx - 1
                if 0 <= m < W:
                    M24[dy * WP + m, j * CH:(j + 1) * CH] = w3[:, 0, dy, dx]
    # Fold the lookup table into the conv matrix, and fold the conv bias as an extra
    # row (the kernel's one-hot has a constant 1 in column BIAS_COL).
    T3 = np.zeros((3 * WP, 3 * WP), np.float32)
    for dy in range(3):
        T3[dy * WP:(dy + 1) * WP, dy * WP:(dy + 1) * WP] = table_p
    b3t = np.zeros((WP * CH,), np.float32)
    b3t[:W * CH] = np.tile(np.asarray(params["b3"], np.float32), W)
    M32 = np.zeros((4 * NCP, WP * CH), np.float32)                # (32, 256)
    M32[:3 * WP] = T3 @ M24
    M32[BIAS_COL] = b3t

    # 1x1 conv 32->32 as a block-diagonal matrix over the 8 width positions.
    w2 = np.asarray(params["w2"], np.float32)[:, :, 0, 0]
    BD2 = np.zeros((WP * CH, WP * CH), np.float32)
    for j in range(WP):
        BD2[j * CH:(j + 1) * CH, j * CH:(j + 1) * CH] = w2.T
    b2t = np.zeros((WP * CH,), np.float32)
    b2t[:W * CH] = np.tile(np.asarray(params["b2"], np.float32), W)

    # 1x1 conv 32->16 block-diagonal; output lane width = 8*16 = 128 (lane-dense).
    wc = np.asarray(params["wc"], np.float32)[:, :, 0, 0]
    BD3 = np.zeros((WP * CH, WP * CTX), np.float32)
    for j in range(WP):
        BD3[j * CH:(j + 1) * CH, j * CTX:(j + 1) * CTX] = wc.T
    bct = np.tile(np.asarray(params["bc"], np.float32), WP)       # (128,)

    # Small per-lane vectors packed into a single (4, 256) f32 operand:
    #   row 0: conv2 bias, row 1: BN gamma (tiled), row 2: BN beta (tiled),
    #   row 3[:128]: final conv bias.  Rows 1/2 are replaced with the BN scale/shift
    #   when building the multi-tile emit pass operand.
    vec_base = np.zeros((4, WP * CH), np.float32)
    vec_base[0] = b2t
    vec_base[1] = np.tile(np.asarray(params["gamma"], np.float32), WP)
    vec_base[2] = np.tile(np.asarray(params["beta"], np.float32), WP)
    vec_base[3, :WP * CTX] = bct

    # Width-pooling / channel-expansion matrices for the in-kernel (single-pass)
    # BatchNorm finalize; the padded width block (j = 7) is excluded from pooling.
    G = np.zeros((WP * CH, CH), np.float32)
    for j in range(W):
        G[j * CH:(j + 1) * CH, :] = np.eye(CH, dtype=np.float32)
    Gt = np.tile(np.eye(CH, dtype=np.float32), (1, WP))           # (32, 256)

    return (jnp.asarray(M32, jnp.bfloat16),
            jnp.asarray(BD2, jnp.bfloat16),
            jnp.asarray(BD3, jnp.bfloat16),
            jnp.asarray(vec_base, jnp.float32),
            jnp.asarray(G, jnp.float32),
            jnp.asarray(Gt, jnp.float32))


# --------------------------------------------------------------------------------------
# Forward wrapper
# --------------------------------------------------------------------------------------
def _build_shifted_indices(x, B, L, BL_pad):
    """(BL_pad, 4) int32 one-hot source indices: [row-1 | row (+8) | row+1 (+16) | unused].

    The three neighbour class indices are pre-shifted into disjoint 8-wide ranges so the
    kernel builds a single (TM, 32) one-hot; -1 marks zero padding (batch boundaries in
    the height direction and padded rows) and matches no column."""
    BL = B * L
    xf = x.reshape(BL).astype(jnp.int32)
    xp = jnp.full((BL_pad,), -1, jnp.int32).at[:BL].set(xf)
    r = jnp.arange(BL_pad)
    l = r % L
    inside = r < BL
    up = jnp.where((l > 0) & inside, jnp.roll(xp, 1), -1)
    mid = jnp.where(inside, xp + NC_PAD, -1)
    dn = jnp.where((l < L - 1) & inside, jnp.roll(xp, -1) + 2 * NC_PAD, -1)
    pad = jnp.full((BL_pad,), -1, jnp.int32)
    return jnp.stack([up, mid, dn, pad], axis=1)


def _forward_impl(x, packed):
    """x: (B, L) int32 class indices.  Returns NCHW (B, CONTEXT_SIZE, L, EMBED_DIM)."""
    m32, bd2, bd3, vec_base, g_mat, gt_mat = packed
    B, L = x.shape
    BL = B * L
    inv_n = 1.0 / float(BL * EMBED_DIM)
    CW = W_PAD * HIDDEN_DIM        # 256
    CO = W_PAD * CONTEXT_SIZE      # 128

    if BL <= MAX_SINGLE_TILE:
        # ---- single-pass fast path: stats + normalize + emit in one grid step ------
        TM = _round_up(BL, 8)
        xsh = _build_shifted_indices(x, B, L, TM)
        kernel = functools.partial(_single_pass_kernel, inv_n=inv_n, bn_eps=BN_EPS)
        out_flat = pl.pallas_call(
            kernel,
            out_shape=jax.ShapeDtypeStruct((TM, CO), jnp.float32),
            grid=(1,),
            in_specs=[pl.BlockSpec((TM, 4), lambda i: (0, 0)),
                      pl.BlockSpec(m32.shape, lambda i: (0, 0)),
                      pl.BlockSpec(bd2.shape, lambda i: (0, 0)),
                      pl.BlockSpec(bd3.shape, lambda i: (0, 0)),
                      pl.BlockSpec(vec_base.shape, lambda i: (0, 0)),
                      pl.BlockSpec(g_mat.shape, lambda i: (0, 0)),
                      pl.BlockSpec(gt_mat.shape, lambda i: (0, 0))],
            out_specs=pl.BlockSpec((TM, CO), lambda i: (0, 0)),
            compiler_params=pltpu.CompilerParams(
                dimension_semantics=("arbitrary",)),
        )(xsh, m32, bd2, bd3, vec_base, g_mat, gt_mat)
    else:
        # ---- two passes, both row-parallel (megacore-friendly on v7x) --------------
        TM = MAX_SINGLE_TILE
        BL_pad = _round_up(BL, TM)
        nt = BL_pad // TM
        xsh = _build_shifted_indices(x, B, L, BL_pad)
        const = lambda a: pl.BlockSpec(a.shape, lambda t: (0, 0))

        partials = pl.pallas_call(
            _stats_kernel,
            out_shape=jax.ShapeDtypeStruct((nt * 8, 2 * CW), jnp.float32),
            grid=(nt,),
            in_specs=[pl.BlockSpec((TM, 4), lambda t: (t, 0)),
                      const(m32), const(bd2), const(vec_base)],
            out_specs=pl.BlockSpec((8, 2 * CW), lambda t: (t, 0)),
            compiler_params=pltpu.CompilerParams(
                dimension_semantics=("parallel",)),
        )(xsh, m32, bd2, vec_base)

        # Finalize BatchNorm statistics in plain jnp (tiny) -> keeps both Pallas passes
        # fully parallel and the M=1 finalize matmuls off the MXU.
        tot = jnp.sum(partials, axis=0)                          # (512,)
        colsum = tot[:CW].reshape(W_PAD, HIDDEN_DIM)
        colsum2 = tot[CW:].reshape(W_PAD, HIDDEN_DIM)
        mean_c = jnp.sum(colsum[:EMBED_DIM], axis=0) * inv_n
        ex2_c = jnp.sum(colsum2[:EMBED_DIM], axis=0) * inv_n
        var_c = ex2_c - mean_c * mean_c                          # biased, like torch
        gamma_c = vec_base[1, :HIDDEN_DIM]
        beta_c = vec_base[2, :HIDDEN_DIM]
        scale_c = gamma_c * lax.rsqrt(var_c + BN_EPS)
        shift_c = beta_c - mean_c * scale_c
        vec_emit = vec_base.at[1].set(jnp.tile(scale_c, W_PAD)) \
                           .at[2].set(jnp.tile(shift_c, W_PAD))

        out_flat = pl.pallas_call(
            _emit_kernel,
            out_shape=jax.ShapeDtypeStruct((BL_pad, CO), jnp.float32),
            grid=(nt,),
            in_specs=[pl.BlockSpec((TM, 4), lambda t: (t, 0)),
                      const(m32), const(bd2), const(bd3), const(vec_emit)],
            out_specs=pl.BlockSpec((TM, CO), lambda t: (t, 0)),
            compiler_params=pltpu.CompilerParams(
                dimension_semantics=("parallel",)),
        )(xsh, m32, bd2, bd3, vec_emit)

    # (BL_pad, 8*16) -> drop row padding, drop padded width column, NCHW.
    out = out_flat[:BL].reshape(B, L, W_PAD, CONTEXT_SIZE)[:, :, :EMBED_DIM, :]
    return out.transpose(0, 3, 1, 2)


adj_context_net_forward = jax.jit(_forward_impl)


# --------------------------------------------------------------------------------------
# Plain-JAX reference (mirrors the PyTorch forward; training-mode BatchNorm, f32 HIGHEST)
# --------------------------------------------------------------------------------------
def reference_forward(x, p):
    emb = p["emb"][x]                                             # (B, L, E)
    h = jax.nn.relu(jnp.dot(emb, p["wl"].T, precision=HP) + p["bl"])
    x4 = h[:, None, :, :]                                         # NCHW (B,1,L,E)
    dn = ("NCHW", "OIHW", "NCHW")
    c1 = jax.nn.relu(
        lax.conv_general_dilated(x4, p["w3"], (1, 1), ((1, 1), (1, 1)),
                                 dimension_numbers=dn, precision=HP)
        + p["b3"][None, :, None, None])
    c2 = lax.conv_general_dilated(c1, p["w2"], (1, 1), "VALID",
                                  dimension_numbers=dn, precision=HP) \
        + p["b2"][None, :, None, None]
    mean = c2.mean(axis=(0, 2, 3), keepdims=True)
    var = ((c2 - mean) ** 2).mean(axis=(0, 2, 3), keepdims=True)  # biased, like torch
    bn = (c2 - mean) / jnp.sqrt(var + BN_EPS) * p["gamma"][None, :, None, None] \
        + p["beta"][None, :, None, None]
    h3 = jax.nn.relu(bn)
    c3 = lax.conv_general_dilated(h3, p["wc"], (1, 1), "VALID",
                                  dimension_numbers=dn, precision=HP) \
        + p["bc"][None, :, None, None]
    return jax.nn.relu(c3)


def _check(name, out, ref):
    out = np.asarray(out)
    ref = np.asarray(ref)
    # bf16 MXU operands vs a float32 (HIGHEST precision) reference.
    if not np.allclose(out, ref, atol=3e-2, rtol=3e-2):
        err = float(np.max(np.abs(out - ref)))
        raise AssertionError(f"{name}: kernel mismatch, max abs err = {err:.5f}")


if __name__ == "__main__":
    key = jax.random.PRNGKey(0)
    pkey, xkey = jax.random.split(key)
    params = make_params(pkey)
    packed = pack_params(params)          # hoisted: done once, shape-independent

    # Small shape (B=2, L=16): exercises the single-pass fast path.
    B, L = 2, 16
    x = jax.random.randint(xkey, (B, L), 0, NUM_CLASSES, dtype=jnp.int32)
    out = jax.block_until_ready(adj_context_net_forward(x, packed))
    assert out.shape == (B, CONTEXT_SIZE, L, EMBED_DIM), out.shape
    _check("single-pass", out, jax.block_until_ready(reference_forward(x, params)))

    # Larger shape: exercises the two-pass (parallel stats + parallel emit) path.
    B2, L2 = 3, 500                        # B*L = 1500 -> two 1024-row tiles
    x2 = jax.random.randint(jax.random.PRNGKey(1), (B2, L2), 0, NUM_CLASSES,
                            dtype=jnp.int32)
    out2 = jax.block_until_ready(adj_context_net_forward(x2, packed))
    _check("two-pass", out2, jax.block_until_ready(reference_forward(x2, params)))

    print("KERNEL_OK")
</pallas_src>

<mosaic_0001>
module attributes {stable_mosaic.version = 11 : i64} {
  func.func @_single_pass_kernel(%arg0: i32, %arg1: memref<32x4xi32, #tpu.memory_space<vmem>>, %arg2: memref<32x256xbf16, #tpu.memory_space<vmem>>, %arg3: memref<256x256xbf16, #tpu.memory_space<vmem>>, %arg4: memref<256x128xbf16, #tpu.memory_space<vmem>>, %arg5: memref<4x256xf32, #tpu.memory_space<vmem>>, %arg6: memref<256x32xf32, #tpu.memory_space<vmem>>, %arg7: memref<32x256xf32, #tpu.memory_space<vmem>>, %arg8: memref<32x128xf32, #tpu.memory_space<vmem>>) attributes {dimension_semantics = [#tpu.dimension_semantics<arbitrary>], iteration_bounds = array<i64: 1>, scalar_prefetch = 0 : i64, scratch_operands = 0 : i64, tpu.core_type = #tpu.core_type<tc>, window_params = [{pipeline_mode = #tpu.pipeline_mode<synchronous>, transform_indices = @transform_0, window_bounds = array<i64: 32, 4>}, {pipeline_mode = #tpu.pipeline_mode<synchronous>, transform_indices = @transform_1, window_bounds = array<i64: 32, 256>}, {pipeline_mode = #tpu.pipeline_mode<synchronous>, transform_indices = @transform_2, window_bounds = array<i64: 256, 256>}, {pipeline_mode = #tpu.pipeline_mode<synchronous>, transform_indices = @transform_3, window_bounds = array<i64: 256, 128>}, {pipeline_mode = #tpu.pipeline_mode<synchronous>, transform_indices = @transform_4, window_bounds = array<i64: 4, 256>}, {pipeline_mode = #tpu.pipeline_mode<synchronous>, transform_indices = @transform_5, window_bounds = array<i64: 256, 32>}, {pipeline_mode = #tpu.pipeline_mode<synchronous>, transform_indices = @transform_6, window_bounds = array<i64: 32, 256>}, {pipeline_mode = #tpu.pipeline_mode<synchronous>, transform_indices = @transform_7, window_bounds = array<i64: 32, 128>}]} {
    %c0 = arith.constant 0 : index
    %c0_0 = arith.constant 0 : index
    %0 = vector.load %arg5[%c0, %c0_0] : memref<4x256xf32, #tpu.memory_space<vmem>>, vector<1x256xf32>
    %c0_1 = arith.constant 0 : index
    %c0_2 = arith.constant 0 : index
    %1 = vector.load %arg1[%c0_1, %c0_2] : memref<32x4xi32, #tpu.memory_space<vmem>>, vector<32x4xi32>
    %2 = tpu.iota {dimensions = array<i32: 1>} : vector<32x32xi32>
    %3 = vector.extract_strided_slice %1 {offsets = [0, 0], sizes = [32, 1], strides = [1, 1]} : vector<32x4xi32> to vector<32x1xi32>
    %4 = vector.broadcast %3 : vector<32x1xi32> to vector<32x32xi32>
    %5 = arith.cmpi eq, %2, %4 : vector<32x32xi32>
    %6 = vector.extract_strided_slice %1 {offsets = [0, 1], sizes = [32, 1], strides = [1, 1]} : vector<32x4xi32> to vector<32x1xi32>
    %7 = vector.broadcast %6 : vector<32x1xi32> to vector<32x32xi32>
    %8 = arith.cmpi eq, %2, %7 : vector<32x32xi32>
    %9 = arith.ori %5, %8 : vector<32x32xi1>
    %10 = vector.extract_strided_slice %1 {offsets = [0, 2], sizes = [32, 1], strides = [1, 1]} : vector<32x4xi32> to vector<32x1xi32>
    %11 = vector.broadcast %10 : vector<32x1xi32> to vector<32x32xi32>
    %12 = arith.cmpi eq, %2, %11 : vector<32x32xi32>
    %13 = arith.ori %9, %12 : vector<32x32xi1>
    %c24_i32 = arith.constant 24 : i32
    %14 = vector.broadcast %c24_i32 : i32 to vector<32x32xi32>
    %15 = arith.cmpi eq, %2, %14 : vector<32x32xi32>
    %16 = arith.ori %13, %15 : vector<32x32xi1>
    %17 = arith.extui %16 : vector<32x32xi1> to vector<32x32xi32>
    %18 = arith.sitofp %17 : vector<32x32xi32> to vector<32x32xf32>
    %19 = arith.truncf %18 : vector<32x32xf32> to vector<32x32xbf16>
    %c0_3 = arith.constant 0 : index
    %c0_4 = arith.constant 0 : index
    %20 = vector.load %arg2[%c0_3, %c0_4] : memref<32x256xbf16, #tpu.memory_space<vmem>>, vector<32x256xbf16>
    %cst = arith.constant dense<0.000000e+00> : vector<32x256xf32>
    %21 = tpu.matmul %19, %20, %cst {dimension_numbers = #tpu.dot_dimension_numbers<[1], [0], [0], [1], [0, 0, 1, 1], [], []>} : vector<32x32xbf16>, vector<32x256xbf16>, vector<32x256xf32> -> vector<32x256xf32>
    %cst_5 = arith.constant 0.000000e+00 : f32
    %22 = vector.broadcast %cst_5 : f32 to vector<32x256xf32>
    %23 = arith.maximumf %21, %22 : vector<32x256xf32>
    %24 = arith.truncf %23 : vector<32x256xf32> to vector<32x256xbf16>
    %c0_6 = arith.constant 0 : index
    %c0_7 = arith.constant 0 : index
    %25 = vector.load %arg3[%c0_6, %c0_7] : memref<256x256xbf16, #tpu.memory_space<vmem>>, vector<256x256xbf16>
    %cst_8 = arith.constant dense<0.000000e+00> : vector<32x256xf32>
    %26 = tpu.matmul %24, %25, %cst_8 {dimension_numbers = #tpu.dot_dimension_numbers<[1], [0], [0], [1], [0, 0, 1, 1], [], []>} : vector<32x256xbf16>, vector<256x256xbf16>, vector<32x256xf32> -> vector<32x256xf32>
    %27 = vector.broadcast %0 : vector<1x256xf32> to vector<32x256xf32>
    %28 = arith.addf %26, %27 : vector<32x256xf32>
    %29 = vector.extract_strided_slice %1 {offsets = [0, 1], sizes = [32, 1], strides = [1, 1]} : vector<32x4xi32> to vector<32x1xi32>
    %c0_i32 = arith.constant 0 : i32
    %30 = vector.broadcast %c0_i32 : i32 to vector<32x1xi32>
    %31 = arith.cmpi sge, %29, %30 : vector<32x1xi32>
    %32 = arith.extui %31 : vector<32x1xi1> to vector<32x1xi32>
    %33 = arith.sitofp %32 : vector<32x1xi32> to vector<32x1xf32>
    %34 = vector.broadcast %33 : vector<32x1xf32> to vector<32x256xf32>
    %35 = arith.mulf %28, %34 : vector<32x256xf32>
    %cst_9 = arith.constant dense<0.000000e+00> : vector<256xf32>
    %36 = vector.multi_reduction <add>, %35, %cst_9 [0] : vector<32x256xf32> to vector<256xf32>
    %37 = vector.shape_cast %36 : vector<256xf32> to vector<1x256xf32>
    %38 = arith.mulf %35, %28 : vector<32x256xf32>
    %cst_10 = arith.constant dense<0.000000e+00> : vector<256xf32>
    %39 = vector.multi_reduction <add>, %38, %cst_10 [0] : vector<32x256xf32> to vector<256xf32>
    %40 = vector.shape_cast %39 : vector<256xf32> to vector<1x256xf32>
    %c0_11 = arith.constant 0 : index
    %c0_12 = arith.constant 0 : index
    %41 = vector.load %arg6[%c0_11, %c0_12] : memref<256x32xf32, #tpu.memory_space<vmem>>, vector<256x32xf32>
    %cst_13 = arith.constant dense<0.000000e+00> : vector<1x32xf32>
    %42 = tpu.matmul %37, %41, %cst_13 {dimension_numbers = #tpu.dot_dimension_numbers<[1], [0], [0], [1], [0, 0, 1, 1], [], []>, precision = #tpu.contract_precision<fp32>} : vector<1x256xf32>, vector<256x32xf32>, vector<1x32xf32> -> vector<1x32xf32>
    %cst_14 = arith.constant 0.00446428591 : f32
    %43 = vector.broadcast %cst_14 : f32 to vector<1x32xf32>
    %44 = arith.mulf %42, %43 : vector<1x32xf32>
    %c0_15 = arith.constant 0 : index
    %c0_16 = arith.constant 0 : index
    %45 = vector.load %arg6[%c0_15, %c0_16] : memref<256x32xf32, #tpu.memory_space<vmem>>, vector<256x32xf32>
    %cst_17 = arith.constant dense<0.000000e+00> : vector<1x32xf32>
    %46 = tpu.matmul %40, %45, %cst_17 {dimension_numbers = #tpu.dot_dimension_numbers<[1], [0], [0], [1], [0, 0, 1, 1], [], []>, precision = #tpu.contract_precision<fp32>} : vector<1x256xf32>, vector<256x32xf32>, vector<1x32xf32> -> vector<1x32xf32>
    %cst_18 = arith.constant 0.00446428591 : f32
    %47 = vector.broadcast %cst_18 : f32 to vector<1x32xf32>
    %48 = arith.mulf %46, %47 : vector<1x32xf32>
    %c0_19 = arith.constant 0 : index
    %c0_20 = arith.constant 0 : index
    %49 = vector.load %arg7[%c0_19, %c0_20] : memref<32x256xf32, #tpu.memory_space<vmem>>, vector<32x256xf32>
    %cst_21 = arith.constant dense<0.000000e+00> : vector<1x256xf32>
    %50 = tpu.matmul %44, %49, %cst_21 {dimension_numbers = #tpu.dot_dimension_numbers<[1], [0], [0], [1], [0, 0, 1, 1], [], []>, precision = #tpu.contract_precision<fp32>} : vector<1x32xf32>, vector<32x256xf32>, vector<1x256xf32> -> vector<1x256xf32>
    %c0_22 = arith.constant 0 : index
    %c0_23 = arith.constant 0 : index
    %51 = vector.load %arg7[%c0_22, %c0_23] : memref<32x256xf32, #tpu.memory_space<vmem>>, vector<32x256xf32>
    %cst_24 = arith.constant dense<0.000000e+00> : vector<1x256xf32>
    %52 = tpu.matmul %48, %51, %cst_24 {dimension_numbers = #tpu.dot_dimension_numbers<[1], [0], [0], [1], [0, 0, 1, 1], [], []>, precision = #tpu.contract_precision<fp32>} : vector<1x32xf32>, vector<32x256xf32>, vector<1x256xf32> -> vector<1x256xf32>
    %53 = arith.mulf %50, %50 : vector<1x256xf32>
    %54 = arith.subf %52, %53 : vector<1x256xf32>
    %c1 = arith.constant 1 : index
    %c0_25 = arith.constant 0 : index
    %55 = vector.load %arg5[%c1, %c0_25] : memref<4x256xf32, #tpu.memory_space<vmem>>, vector<1x256xf32>
    %cst_26 = arith.constant 9.99999974E-6 : f32
    %56 = vector.broadcast %cst_26 : f32 to vector<1x256xf32>
    %57 = arith.addf %54, %56 : vector<1x256xf32>
    %58 = math.rsqrt %57 : vector<1x256xf32>
    %59 = arith.mulf %55, %58 : vector<1x256xf32>
    %c2 = arith.constant 2 : index
    %c0_27 = arith.constant 0 : index
    %60 = vector.load %arg5[%c2, %c0_27] : memref<4x256xf32, #tpu.memory_space<vmem>>, vector<1x256xf32>
    %61 = arith.mulf %50, %59 : vector<1x256xf32>
    %62 = arith.subf %60, %61 : vector<1x256xf32>
    %63 = vector.broadcast %59 : vector<1x256xf32> to vector<32x256xf32>
    %64 = arith.mulf %28, %63 : vector<32x256xf32>
    %65 = vector.broadcast %62 : vector<1x256xf32> to vector<32x256xf32>
    %66 = arith.addf %64, %65 : vector<32x256xf32>
    %cst_28 = arith.constant 0.000000e+00 : f32
    %67 = vector.broadcast %cst_28 : f32 to vector<32x256xf32>
    %68 = arith.maximumf %66, %67 : vector<32x256xf32>
    %69 = arith.truncf %68 : vector<32x256xf32> to vector<32x256xbf16>
    %c0_29 = arith.constant 0 : index
    %c0_30 = arith.constant 0 : index
    %70 = vector.load %arg4[%c0_29, %c0_30] : memref<256x128xbf16, #tpu.memory_space<vmem>>, vector<256x128xbf16>
    %cst_31 = arith.constant dense<0.000000e+00> : vector<32x128xf32>
    %71 = tpu.matmul %69, %70, %cst_31 {dimension_numbers = #tpu.dot_dimension_numbers<[1], [0], [0], [1], [0, 0, 1, 1], [], []>} : vector<32x256xbf16>, vector<256x128xbf16>, vector<32x128xf32> -> vector<32x128xf32>
    %c3 = arith.constant 3 : index
    %c0_32 = arith.constant 0 : index
    %72 = vector.load %arg5[%c3, %c0_32] : memref<4x256xf32, #tpu.memory_space<vmem>>, vector<1x128xf32>
    %73 = vector.broadcast %72 : vector<1x128xf32> to vector<32x128xf32>
    %74 = arith.addf %71, %73 : vector<32x128xf32>
    %cst_33 = arith.constant 0.000000e+00 : f32
    %75 = vector.broadcast %cst_33 : f32 to vector<32x128xf32>
    %76 = arith.maximumf %74, %75 : vector<32x128xf32>
    %c0_34 = arith.constant 0 : index
    %c0_35 = arith.constant 0 : index
    %77 = vector.load %arg8[%c0_34, %c0_35] : memref<32x128xf32, #tpu.memory_space<vmem>>, vector<32x128xf32>
    tpu.vector_store %arg8[%c0_34, %c0_35], %76 {strides = array<i32>} : memref<32x128xf32, #tpu.memory_space<vmem>>, vector<32x128xf32>,
    return
  }
  func.func @transform_0(%arg0: i32) -> (i32, i32) {
    %c0_i32 = arith.constant 0 : i32
    %c0_i32_0 = arith.constant 0 : i32
    %c0_i32_1 = arith.constant 0 : i32
    return %c0_i32, %c0_i32_0 : i32, i32
  }
  func.func @transform_1(%arg0: i32) -> (i32, i32) {
    %c0_i32 = arith.constant 0 : i32
    %c0_i32_0 = arith.constant 0 : i32
    %c0_i32_1 = arith.constant 0 : i32
    return %c0_i32, %c0_i32_0 : i32, i32
  }
  func.func @transform_2(%arg0: i32) -> (i32, i32) {
    %c0_i32 = arith.constant 0 : i32
    %c0_i32_0 = arith.constant 0 : i32
    %c0_i32_1 = arith.constant 0 : i32
    return %c0_i32, %c0_i32_0 : i32, i32
  }
  func.func @transform_3(%arg0: i32) -> (i32, i32) {
    %c0_i32 = arith.constant 0 : i32
    %c0_i32_0 = arith.constant 0 : i32
    %c0_i32_1 = arith.constant 0 : i32
    return %c0_i32, %c0_i32_0 : i32, i32
  }
  func.func @transform_4(%arg0: i32) -> (i32, i32) {
    %c0_i32 = arith.constant 0 : i32
    %c0_i32_0 = arith.constant 0 : i32
    %c0_i32_1 = arith.constant 0 : i32
    return %c0_i32, %c0_i32_0 : i32, i32
  }
  func.func @transform_5(%arg0: i32) -> (i32, i32) {
    %c0_i32 = arith.constant 0 : i32
    %c0_i32_0 = arith.constant 0 : i32
    %c0_i32_1 = arith.constant 0 : i32
    return %c0_i32, %c0_i32_0 : i32, i32
  }
  func.func @transform_6(%arg0: i32) -> (i32, i32) {
    %c0_i32 = arith.constant 0 : i32
    %c0_i32_0 = arith.constant 0 : i32
    %c0_i32_1 = arith.constant 0 : i32
    return %c0_i32, %c0_i32_0 : i32, i32
  }
  func.func @transform_7(%arg0: i32) -> (i32, i32) {
    %c0_i32 = arith.constant 0 : i32
    %c0_i32_0 = arith.constant 0 : i32
    %c0_i32_1 = arith.constant 0 : i32
    return %c0_i32, %c0_i32_0 : i32, i32
  }
}

</mosaic_0001>

<bundles_post_ra>
// kernel: _forward_impl.1
= control target key start
LH: loop header
LB: loop body
LE: loop exit
PB: predicated region body
PF: predicated region fallthrough
CT: control target
= control target key end

     0   :  { %12 = vsyncpa [#allocation3], 0  ;;  %s5844_s0 = inlined_call_operand.vmem [shape: s32[32,4], index: 0, kind: input, shape index: {}]   ;;  %s5845_s1 = inlined_call_operand.hbm [shape: bf16[32,256], index: 1, kind: input, shape index: {}]   ;;  %s5846_s2 = inlined_call_operand.vmem [shape: bf16[256,256], index: 2, kind: input, shape index: {}]   ;;  %s5847_s3 = inlined_call_operand.vmem [shape: bf16[256,128], index: 3, kind: input, shape index: {}]   ;;  %s5848_s4 = inlined_call_operand.vmem [shape: f32[4,256], index: 4, kind: input, shape index: {}]   ;;  %s5849_s5 = inlined_call_operand.vmem [shape: f32[256,32], index: 5, kind: input, shape index: {}]   ;;  %s5850_s6 = inlined_call_operand.hbm [shape: f32[32,256], index: 6, kind: input, shape index: {}]   ;;  %s5851_s7 = inlined_call_operand.vmem [shape: f32[32,128], index: 7, kind: output, shape index: {}]  }
   0x1   :  { %13 = vsyncpa [#allocation5], 0  ;;  %s4383_s24 = smov [#allocation2]  }
   0x2   :  { %s21_s25 = sshll.u32 %s4383_s24, 4  ;;  %s22_s25 = int_to_ptr.vmem [resolvable:$true] %s21_s25 }
   0x3   :  { %s4347_s26 = scalar_lea.vmem %s22_s25, 512  ;;  %p4352_p1 = scmp.lt.s32.totalorder %s22_s25, %s22_s25 }
   0x4   :  { %p4348_p0 = scmp.ne.s32.totalorder %s22_s25, %s4347_s26  ;;  %p4353_p2 = scmp.lt.s32.totalorder %s4347_s26, %s4347_s26 }
   0x6   :  { %p4354_p3 = por %p4353_p2, %p4352_p1 }
   0x8   :  { %p4355_p4 = pnand %p4354_p3, %p4348_p0 }
   0xa   :  { %4358 = shalt.err (!%p4355_p4)
}
   0xb   :  { %s4384_s27 = smov 128   ;;  %s4385_s28 = smov 8  }
   0xc   :  { %27 = dma.hbm_to_vmem [thread:$0]  %s5845_s1, 512, %s22_s25, [#allocation3], %s4384_s27, %s4384_s27, %s4385_s28  }
   0xd   :  { %s4386_s8 = smov [#allocation4]  }
   0xe   :  { %s41_s9 = sshll.u32 %s4386_s8, 4  ;;  %s42_s9 = int_to_ptr.vmem [resolvable:$true] %s41_s9 }
   0xf   :  { %s4367_s10 = scalar_lea.vmem %s42_s9, 1024  ;;  %p4372_p6 = scmp.lt.s32.totalorder %s42_s9, %s42_s9 }
  0x10   :  { %p4368_p5 = scmp.ne.s32.totalorder %s42_s9, %s4367_s10  ;;  %p4373_p7 = scmp.lt.s32.totalorder %s4367_s10, %s4367_s10 }
  0x12   :  { %p4374_p8 = por %p4373_p7, %p4372_p6 }
  0x14   :  { %p4375_p9 = pnand %p4374_p8, %p4368_p5 }
  0x16   :  { %4378 = shalt.err (!%p4375_p9)
}
  0x17   :  { %s4387_s11 = smov 256   ;;  %s4388_s12 = smov 16  }
  0x18   :  { %47 = dma.hbm_to_vmem [thread:$0]  %s5850_s6, 1024, %s42_s9, [#allocation5], %s4387_s11, %s4387_s11, %s4388_s12  }
  0x19   :  { %4379 = dma.done.wait [#allocation3], 512  }
  0x1a   :  { %4380 = vsyncadd [#allocation3], 4294966784 }
  0x1b   :  { %4381 = dma.done.wait [#allocation5], 1024  }
  0x1c   :  { %4382 = vsyncadd [#allocation5], 4294966272  ;;  %v4389_v0 = vmov 1   ;;  %v4390_v1 = vmov 0   ;;  %v4445_v2 = vld [vmem:[%s5844_s0] sm:$0xff]  ;;  %v4452_v3 = vld [vmem:[%s5844_s0 + $0x8] sm:$0xff]  ;;  %v5854_v37 = vlaneseq }
  0x1d   :  { %4250 = vset.pattern.permute.xlu1 %v4389_v0  ;;  %4249 = vset.pattern.permute.xlu0 %v4390_v1  ;;  %v4265_v4 = vld [vmem:[#allocation2 + $0x14] ss:$8 sps:$4 sm:$0xff]   ;;  %v4391_v5 = vmov 2   ;;  %v4267_v6 = vld [vmem:[#allocation2 + $0x10] ss:$8 sps:$4 sm:$0xff]   ;;  %v5852_v47 = vmov 0.0  }
  0x1e   :  { %196 = vmatprep.mubr.bf16.mxu0 %v4390_v1  ;;  %79 = vperm.xlu1 %4250, %v4445_v2   ;;  %v4268_v7 = vld [vmem:[#allocation2 + $0x4] ss:$8 sps:$4 sm:$0xff]   ;;  %v4270_v8 = vld [vmem:[#allocation2] ss:$8 sps:$4 sm:$0xff]   ;;  %v4461_v9 = vld [vmem:[%s5844_s0 + $0x10] sm:$0xff]  ;;  %v61_v38 = vand.u32 127, %v5854_v37 }
  0x1f   :  { %63 = vperm.xlu0 %4249, %v4445_v2   ;;  %176 = vmatprep.subr.bf16.mxu0 %v4265_v4  ;;  %v4466_v10 = vld [vmem:[%s5844_s0 + $0x18] sm:$0xff]  ;;  %v4274_v13 = vld [vmem:[%s5846_s2 + $0x64] ss:$8 sps:$4 sm:$0xff]   ;;  %v4276_v14 = vld [vmem:[%s5846_s2 + $0x60] ss:$8 sps:$4 sm:$0xff]   ;;  %vm157_vm13 = vcmask 261120  }
  0x20   :  { %177 = vmatpush1.bf16.msra.mxu0 %v4267_v6  ;;  %v4271_v11 = vld [vmem:[%s5846_s2 + $0x74] ss:$8 sps:$4 sm:$0xff]   ;;  %v4273_v12 = vld [vmem:[%s5846_s2 + $0x70] ss:$8 sps:$4 sm:$0xff]   ;;  %v4280_v17 = vld [vmem:[%s5846_s2 + $0x44] ss:$8 sps:$4 sm:$0xff]  }
  0x21   :  { %178 = vmatprep.subr.bf16.mxu0 %v4268_v7  ;;  %432 = vmatprep.subr.bf16.mxu1 %v4271_v11  ;;  %v4277_v15 = vld [vmem:[%s5846_s2 + $0x54] ss:$8 sps:$4 sm:$0xff]   ;;  %v4279_v16 = vld [vmem:[%s5846_s2 + $0x50] ss:$8 sps:$4 sm:$0xff]   ;;  %v4282_v18 = vld [vmem:[%s5846_s2 + $0x40] ss:$8 sps:$4 sm:$0xff]  }
  0x22   :  { %82 = vperm.xlu1 %4250, %v4452_v3   ;;  %433 = vmatpush1.bf16.msra.mxu1 %v4273_v12  ;;  %v4283_v19 = vld [vmem:[%s5846_s2 + $0x34] ss:$8 sps:$4 sm:$0xff]   ;;  %v4285_v20 = vld [vmem:[%s5846_s2 + $0x30] ss:$8 sps:$4 sm:$0xff]   ;;  %v4286_v21 = vld [vmem:[%s5846_s2 + $0x24] ss:$8 sps:$4 sm:$0xff]  }
  0x23   :  { %4251 = vset.pattern.permute.xlu0 %v4391_v5  ;;  %434 = vmatprep.subr.bf16.mxu1 %v4274_v13  ;;  %v4288_v22 = vld [vmem:[%s5846_s2 + $0x20] ss:$8 sps:$4 sm:$0xff]   ;;  %v4289_v23 = vld [vmem:[%s5846_s2 + $0x14] ss:$8 sps:$4 sm:$0xff]   ;;  %v4291_v24 = vld [vmem:[%s5846_s2 + $0x10] ss:$8 sps:$4 sm:$0xff]  }
  0x24   :  { %99 = vperm.xlu0 %4251, %v4445_v2   ;;  %179 = vmatpush1.bf16.msra.mxu0 %v4270_v8  ;;  %v4292_v25 = vld [vmem:[%s5846_s2 + $0x4] ss:$8 sps:$4 sm:$0xff]   ;;  %v4294_v26 = vld [vmem:[%s5846_s2] ss:$8 sps:$4 sm:$0xff]   ;;  %v4295_v27 = vld [vmem:[%s5846_s2 + $0xf4] ss:$8 sps:$4 sm:$0xff]  }
  0x25   :  { %v4297_v28 = vld [vmem:[%s5846_s2 + $0xf0] ss:$8 sps:$4 sm:$0xff]   ;;  %v4298_v29 = vld [vmem:[%s5846_s2 + $0xe4] ss:$8 sps:$4 sm:$0xff]   ;;  %v4300_v30 = vld [vmem:[%s5846_s2 + $0xe0] ss:$8 sps:$4 sm:$0xff]  }
  0x26   :  { %4253 = vset.pattern.permute.xlu1 %v4391_v5  ;;  %435 = vmatpush1.bf16.msra.mxu1 %v4276_v14  ;;  %v4301_v31 = vld [vmem:[%s5846_s2 + $0xd4] ss:$8 sps:$4 sm:$0xff]   ;;  %v4303_v32 = vld [vmem:[%s5846_s2 + $0xd0] ss:$8 sps:$4 sm:$0xff]   ;;  %v4304_v33 = vld [vmem:[%s5846_s2 + $0xc4] ss:$8 sps:$4 sm:$0xff]  }
  0x27   :  { %102 = vperm.xlu1 %4253, %v4452_v3   ;;  %436 = vmatprep.subr.bf16.mxu1 %v4277_v15  ;;  %v4306_v34 = vld [vmem:[%s5846_s2 + $0xc0] ss:$8 sps:$4 sm:$0xff]   ;;  %v4307_v35 = vld [vmem:[%s5846_s2 + $0xb4] ss:$8 sps:$4 sm:$0xff]   ;;  %v4309_v36 = vld [vmem:[%s5846_s2 + $0xb0] ss:$8 sps:$4 sm:$0xff]  }
  0x28   :  { %4252 = vset.pattern.permute.xlu0 %v4390_v1  ;;  %vm118_vm4 = vcmp.eq.s32.totalorder %v61_v38, 24  ;;  %v4310_v58 = vld [vmem:[%s5846_s2 + $0xa4] ss:$8 sps:$4 sm:$0xff]   ;;  %v4312_v59 = vld [vmem:[%s5846_s2 + $0xa0] ss:$8 sps:$4 sm:$0xff]  }
  0x29   :  { %66 = vperm.xlu0 %4252, %v4452_v3   ;;  %v4313_v60 = vld [vmem:[%s5846_s2 + $0x94] ss:$8 sps:$4 sm:$0xff]   ;;  %v4315_v61 = vld [vmem:[%s5846_s2 + $0x90] ss:$8 sps:$4 sm:$0xff]   ;;  %v4316_v62 = vld [vmem:[%s5846_s2 + $0x84] ss:$8 sps:$4 sm:$0xff]  }
  0x2a   :  { %437 = vmatpush1.bf16.msra.mxu1 %v4279_v16  ;;  %v4318_v63 = vld [vmem:[%s5846_s2 + $0x80] ss:$8 sps:$4 sm:$0xff]  }
  0x2b   :  { %4254 = vset.pattern.permute.xlu1 %v4390_v1  ;;  %438 = vmatprep.subr.bf16.mxu1 %v4280_v17 }
  0x2c   :  { %69 = vperm.xlu1 %4254, %v4461_v9  }
  0x2d   :  { %72 = vperm.xlu0 %4252, %v4466_v10  }
  0x2e   :  { %439 = vmatpush1.bf16.msra.mxu1 %v4282_v18 }
  0x2f   :  { %440 = vmatprep.subr.bf16.mxu1 %v4283_v19 }
  0x30   :  { %4255 = vset.pattern.permute.xlu1 %v4389_v0 }
  0x31   :  { %4256 = vset.pattern.permute.xlu0 %v4391_v5  ;;  %85 = vperm.xlu1 %4255, %v4461_v9  }
  0x32   :  { %105 = vperm.xlu0 %4256, %v4461_v9   ;;  %441 = vmatpush1.bf16.msra.mxu1 %v4285_v20 }
  0x33   :  { %442 = vmatprep.subr.bf16.mxu1 %v4286_v21 }
  0x35   :  { %88 = vperm.xlu1 %4255, %v4466_v10  }
  0x36   :  { %4264 = vset.pattern.permute.xlu0 %v4389_v0  ;;  %443 = vmatpush1.bf16.msra.mxu1 %v4288_v22 }
  0x37   :  { %444 = vmatprep.subr.bf16.mxu1 %v4289_v23 }
  0x39   :  { %4257 = vset.pattern.permute.xlu1 %v4391_v5 }
  0x3a   :  { %108 = vperm.xlu1 %4257, %v4466_v10   ;;  %445 = vmatpush1.bf16.msra.mxu1 %v4291_v24 }
  0x3b   :  { %446 = vmatprep.subr.bf16.mxu1 %v4292_v25  ;;  %v600_v25 = vld [vmem:[%s5849_s5 + $0xf8] sm:$0xff] }
  0x3e   :  { %4258 = vset.pattern.permute.xlu1 %v4389_v0  ;;  %447 = vmatpush1.bf16.msra.mxu1 %v4294_v26  ;;  %v4595_v26 = vand.u32 4294901760, %v600_v25 }
  0x3f   :  { %448 = vmatprep.subr.bf16.mxu1 %v4295_v27  ;;  %v584_v27 = vld [vmem:[%s5849_s5 + $0x78] sm:$0xff] }
  0x40   :  { %6017 = vst [vmem:[#allocation8_spill] sm:$0xff] %v4595_v26  ;;  %3790 = vmatprep.subr.mxu0 %v4595_v26 }
  0x42   :  { %449 = vmatpush2.bf16.msra.mxu1 %v4297_v28  ;;  %v4600_v28 = vand.u32 4294901760, %v584_v27 }
  0x43   :  { %450 = vmatprep.subr.bf16.mxu1 %v4298_v29  ;;  %v599_v29 = vld [vmem:[%s5849_s5 + $0xf0] sm:$0xff] }
  0x44   :  { %6018 = vst [vmem:[#allocation9_spill] sm:$0xff] %v4600_v28 }
  0x46   :  { %451 = vmatpush2.bf16.msra.mxu1 %v4300_v30  ;;  %v4606_v30 = vsub.f32 %v600_v25, %v4595_v26 }
  0x47   :  { %452 = vmatprep.subr.bf16.mxu1 %v4301_v31  ;;  %v4608_v31 = vand.u32 4294901760, %v599_v29 }
  0x48   :  { %6019 = vst [vmem:[#allocation10_spill] sm:$0xff] %v4606_v30 }
  0x49   :  { %6020 = vst [vmem:[#allocation11_spill] sm:$0xff] %v4608_v31 }
  0x4a   :  { %453 = vmatpush2.bf16.msra.mxu1 %v4303_v32  ;;  %v583_v32 = vld [vmem:[%s5849_s5 + $0x70] sm:$0xff] }
  0x4b   :  { %454 = vmatprep.subr.bf16.mxu1 %v4304_v33  ;;  %v4615_v33 = vsub.f32 %v584_v27, %v4600_v28 }
  0x4e   :  { %455 = vmatpush2.bf16.msra.mxu1 %v4306_v34  ;;  %v4617_v34 = vand.u32 4294901760, %v583_v32 }
  0x4f   :  { %456 = vmatprep.subr.bf16.mxu1 %v4307_v35  ;;  %v598_v35 = vld [vmem:[%s5849_s5 + $0xe8] sm:$0xff] }
  0x50   :  { %6021 = vst [vmem:[#allocation12_spill] sm:$0xff] %v4617_v34 }
  0x52   :  { %457 = vmatpush2.bf16.msra.mxu1 %v4309_v36  ;;  %v4625_v36 = vsub.f32 %v599_v29, %v4608_v31  ;;  %v589_v29 = vld [vmem:[%s5849_s5 + $0xa0] sm:$0xff] }
  0x53   :  { %458 = vmatprep.subr.bf16.mxu1 %v4310_v58  ;;  %v579_v58 = vld [vmem:[%s5849_s5 + $0x50] sm:$0xff] }
  0x56   :  { %459 = vmatpush2.bf16.msra.mxu1 %v4312_v59 }
  0x57   :  { %460 = vmatprep.subr.bf16.mxu1 %v4313_v60  ;;  %v4698_v60 = vand.u32 4294901760, %v579_v58 }
  0x59   :  { %6029 = vst [vmem:[#allocation20_spill] sm:$0xff] %v4698_v60 }
  0x5a   :  { %461 = vmatpush2.bf16.msra.mxu1 %v4315_v61  ;;  %v594_v61 = vld [vmem:[%s5849_s5 + $0xc8] sm:$0xff] }
  0x5b   :  { %462 = vmatprep.subr.bf16.mxu1 %v4316_v62 }
  0x5e   :  { %463 = vmatpush2.bf16.msra.mxu1 %v4318_v63  ;;  %v4707_v63 = vand.u32 4294901760, %v594_v61 }
  0x5f   :  { %3860 = vmatprep.subr.mxu1 %v4606_v30 }
  0x60   :  { %6030 = vst [vmem:[#allocation21_spill] sm:$0xff] %v4707_v63 }
  0x99   :  { %v80_v39 = vpop.permute.xlu1 %79 }
  0x9a   :  { %v64_v40 = vpop.permute.xlu0 %63  ;;  %vm90_vm0 = vcmp.eq.s32.totalorder %v61_v38, %v80_v39  ;;  %v582_v39 = vld [vmem:[%s5849_s5 + $0x68] sm:$0xff] }
  0x9b   :  { %vm74_vm1 = vcmp.eq.s32.totalorder %v61_v38, %v64_v40  ;;  %v4635_v40 = vsub.f32 %v583_v32, %v4617_v34 }
  0x9c   :  { %vm94_vm3 = vmor %vm74_vm1, %vm90_vm0 }
  0x9d   :  { %v83_v41 = vpop.permute.xlu1 %82 }
  0x9e   :  { %vm91_vm6 = vcmp.eq.s32.totalorder %v61_v38, %v83_v41  ;;  %v4637_v41 = vand.u32 4294901760, %v582_v39 }
  0x9f   :  { %v100_v42 = vpop.permute.xlu0 %99 }
  0xa0   :  { %vm110_vm2 = vcmp.eq.s32.totalorder %v61_v38, %v100_v42  ;;  %6023 = vst [vmem:[#allocation14_spill] sm:$0xff] %v4637_v41  ;;  %v597_v42 = vld [vmem:[%s5849_s5 + $0xe0] sm:$0xff] }
  0xa1   :  { %vm114_vm5 = vmor %vm94_vm3, %vm110_vm2 }
  0xa2   :  { %v103_v43 = vpop.permute.xlu1 %102  ;;  %vm119_vm7 = vmor %vm114_vm5, %vm118_vm4 }
  0xa3   :  { %vm111_vm9 = vcmp.eq.s32.totalorder %v61_v38, %v103_v43  ;;  %v3725_v48 = vsel %vm119_vm7, 1.0, %v5852_v47 }
  0xa4   :  { %v67_v44 = vpop.permute.xlu0 %66 }
  0xa5   :  { %vm75_vm8 = vcmp.eq.s32.totalorder %v61_v38, %v67_v44  ;;  %v4647_v44 = vand.u32 4294901760, %v597_v42 }
  0xa6   :  { %vm95_vm10 = vmor %vm75_vm8, %vm91_vm6 }
  0xa7   :  { %vm115_vm11 = vmor %vm95_vm10, %vm111_vm9  ;;  %v70_v45 = vpop.permute.xlu1 %69  ;;  %6024 = vst [vmem:[#allocation15_spill] sm:$0xff] %v4647_v44 }
  0xa8   :  { %vm120_vm12 = vmor %vm115_vm11, %vm118_vm4  ;;  %v73_v46 = vpop.permute.xlu0 %72  ;;  %vm76_vm15 = vcmp.eq.s32.totalorder %v61_v38, %v70_v45  ;;  %vm486_vm11 = vcmp.ge.s32.totalorder %v4452_v3, 0  ;;  %v581_v45 = vld [vmem:[%s5849_s5 + $0x60] sm:$0xff] }
  0xa9   :  { %v3726_v49 = vsel %vm120_vm12, 1.0, %v5852_v47  ;;  %vm77_vm5 = vcmp.eq.s32.totalorder %v61_v38, %v73_v46  ;;  %vm487_vm12 = vcmp.ge.s32.totalorder %v4461_v9, 0  ;;  %v4655_v46 = vsub.f32 %v582_v39, %v4637_v41  ;;  %v573_v39 = vld [vmem:[%s5849_s5 + $0x20] sm:$0xff] }
  0xaa   :  { %v131_v50 = vpack.c.bf16 %v3726_v49, %v3725_v48  ;;  %v3769_v4 = vsel %vm487_vm12, 1.0, %v5852_v47  ;;  %v4657_v48 = vand.u32 4294901760, %v581_v45  ;;  %v596_v49 = vld [vmem:[%s5849_s5 + $0xd8] sm:$0xff] }
  0xab   :  { %509 = vperm.xlu0 %4264, %v3769_v4  }
  0xac   :  { %3733 = vmatmul.mubr.msk.bf16.vlgmr.msra.gmra.mxu0 %vm157_vm13, %v131_v50  ;;  %v86_v51 = vpop.permute.xlu1 %85  ;;  %6025 = vst [vmem:[#allocation16_spill] sm:$0xff] %v4657_v48  ;;  %v4665_v50 = vsub.f32 %v597_v42, %v4647_v44 }
  0xad   :  { %v106_v52 = vpop.permute.xlu0 %105  ;;  %206 = vmatprep.mubr.bf16.mxu0 %v4390_v1  ;;  %vm92_vm14 = vcmp.eq.s32.totalorder %v61_v38, %v86_v51  ;;  %v3768_v1 = vsel %vm486_vm11, 1.0, %v5852_v47  ;;  %3791 = vmatpush3.msra.mxu0 %v4600_v28  ;;  %v4667_v51 = vand.u32 4294901760, %v596_v49 }
  0xae   :  { %vm96_vm0 = vmor %vm76_vm15, %vm92_vm14  ;;  %vm112_vm1 = vcmp.eq.s32.totalorder %v61_v38, %v106_v52  ;;  %vm488_vm14 = vcmp.ge.s32.totalorder %v4466_v10, 0  ;;  %3792 = vmatprep.subr.mxu0 %v4608_v31  ;;  %v4672_v52 = vsub.f32 %v581_v45, %v4657_v48  ;;  %v4817_v45 = vand.u32 4294901760, %v573_v39 }
  0xaf   :  { %vm116_vm2 = vmor %vm96_vm0, %vm112_vm1  ;;  %v3770_v6 = vsel %vm488_vm14, 1.0, %v5852_v47  ;;  %3793 = vmatpush3.msra.mxu0 %v4617_v34  ;;  %6026 = vst [vmem:[#allocation17_spill] sm:$0xff] %v4667_v51 }
  0xb0   :  { %v89_v53 = vpop.permute.xlu1 %88  ;;  %vm121_vm6 = vmor %vm116_vm2, %vm118_vm4  ;;  %6041 = vst [vmem:[#allocation32_spill] sm:$0xff] %v4817_v45 }
  0xb1   :  { %vm93_vm3 = vcmp.eq.s32.totalorder %v61_v38, %v89_v53  ;;  %v3727_v55 = vsel %vm121_vm6, 1.0, %v5852_v47  ;;  %v580_v53 = vld [vmem:[%s5849_s5 + $0x58] sm:$0xff] }
  0xb2   :  { %vm97_vm7 = vmor %vm77_vm5, %vm93_vm3 }
  0xb5   :  { %v109_v54 = vpop.permute.xlu1 %108 }
  0xb6   :  { %vm113_vm8 = vcmp.eq.s32.totalorder %v61_v38, %v109_v54  ;;  %v4627_v38 = vand.u32 4294901760, %v598_v35  ;;  %v4680_v54 = vsub.f32 %v596_v49, %v4667_v51  ;;  %v588_v49 = vld [vmem:[%s5849_s5 + $0x98] sm:$0xff] }
  0xb7   :  { %vm117_vm9 = vmor %vm97_vm7, %vm113_vm8 }
  0xb8   :  { %vm122_vm10 = vmor %vm117_vm9, %vm118_vm4  ;;  %vm485_vm4 = vcmp.ge.s32.totalorder %v4445_v2, 0  ;;  %6022 = vst [vmem:[#allocation13_spill] sm:$0xff] %v4627_v38  ;;  %v4645_v43 = vsub.f32 %v598_v35, %v4627_v38  ;;  %3794 = vmatprep.subr.mxu0 %v4627_v38  ;;  %v4807_v35 = vand.u32 4294901760, %v589_v29 }
  0xb9   :  { %v3728_v56 = vsel %vm122_vm10, 1.0, %v5852_v47  ;;  %v3767_v0 = vsel %vm485_vm4, 1.0, %v5852_v47  ;;  %3795 = vmatpush3.msra.mxu0 %v4637_v41 }
  0xba   :  { %v132_v57 = vpack.c.bf16 %v3728_v56, %v3727_v55  ;;  %v4259_v5 = vpack.i.bf16 %v3768_v1, %v3767_v0  ;;  %3796 = vmatprep.subr.mxu0 %v4647_v44  ;;  %v4682_v55 = vand.u32 4294901760, %v580_v53  ;;  %v595_v56 = vld [vmem:[%s5849_s5 + $0xd0] sm:$0xff]  ;;  %v578_v0 = vld [vmem:[%s5849_s5 + $0x48] sm:$0xff]  ;;  %v4715_v1 = vsub.f32 %v579_v58, %v4698_v60  ;;  %6040 = vst [vmem:[#allocation31_spill] sm:$0xff] %v4807_v35  ;;  %v572_v58 = vld [vmem:[%s5849_s5 + $0x18] sm:$0xff] }
  0xbb   :  { %3797 = vmatpush3.msra.mxu0 %v4657_v48  ;;  %v4717_v4 = vand.u32 4294901760, %v578_v0 }
  0xbc   :  { %3734 = vmatmul.mubr.msk.bf16.gmra.mxu0 %vm157_vm13, %v132_v57  ;;  %4260 = vperm.xlu1 %4258, %v4259_v5   ;;  %6027 = vst [vmem:[#allocation18_spill] sm:$0xff] %v4682_v55  ;;  %v4689_v57 = vand.u32 4294901760, %v595_v56  ;;  %v4696_v59 = vsub.f32 %v580_v53, %v4682_v55  ;;  %v593_v5 = vld [vmem:[%s5849_s5 + $0xc0] sm:$0xff]  ;;  %v4825_v53 = vsub.f32 %v589_v29, %v4807_v35 }
  0xbd   :  { %3798 = vmatprep.subr.mxu0 %v4667_v51  ;;  %6031 = vst [vmem:[#allocation22_spill] sm:$0xff] %v4717_v4 }
  0xbe   :  { %6028 = vst [vmem:[#allocation19_spill] sm:$0xff] %v4689_v57  ;;  %3799 = vmatpush3.msra.mxu0 %v4682_v55  ;;  %v4705_v62 = vsub.f32 %v595_v56, %v4689_v57  ;;  %v4827_v56 = vand.u32 4294901760, %v588_v49 }
  0xbf   :  { %3800 = vmatprep.subr.mxu0 %v4689_v57 }
  0xc0   :  { %514 = vperm.xlu1 %4258, %v3770_v6   ;;  %3801 = vmatpush3.msra.mxu0 %v4698_v60  ;;  %v4725_v6 = vsub.f32 %v594_v61, %v4707_v63  ;;  %6042 = vst [vmem:[#allocation33_spill] sm:$0xff] %v4827_v56  ;;  %v4835_v61 = vsub.f32 %v573_v39, %v4817_v45  ;;  %v570_v39 = vld [vmem:[%s5849_s5 + $0x8] sm:$0xff] }
  0xc1   :  { %3802 = vmatprep.subr.mxu0 %v4707_v63 }
  0xc2   :  { %3803 = vmatpush3.msra.mxu0 %v4717_v4 }
 0x16c   :  { %v198_v7 = vpop.f32.mrf.mxu0 }
 0x16d   :  { %v217_v13 = vmax.f32 %v198_v7, 0.0  ;;  %v4727_v7 = vand.u32 4294901760, %v593_v5 }
 0x16e   :  { %v200_v2 = vpop.f32.mrf.mxu0 }
 0x16f   :  { %v218_v9 = vmax.f32 %v200_v2, 0.0  ;;  %6032 = vst [vmem:[#allocation23_spill] sm:$0xff] %v4727_v7  ;;  %v577_v2 = vld [vmem:[%s5849_s5 + $0x40] sm:$0xff]  ;;  %3804 = vmatprep.subr.mxu0 %v4727_v7 }
 0x170   :  { %v202_v8 = vpop.f32.mrf.mxu0 }
 0x171   :  { %v219_v3 = vmax.f32 %v202_v8, 0.0  ;;  %v4735_v8 = vsub.f32 %v578_v0, %v4717_v4  ;;  %v4837_v0 = vand.u32 4294901760, %v572_v58 }
 0x172   :  { %v204_v11 = vpop.f32.mrf.mxu0 }
 0x173   :  { %v220_v12 = vmax.f32 %v204_v11, 0.0  ;;  %v225_v15 = vpack.c.bf16 %v219_v3, %v217_v13  ;;  %v4737_v3 = vand.u32 4294901760, %v577_v2  ;;  %v592_v11 = vld [vmem:[%s5849_s5 + $0xb8] sm:$0xff]  ;;  %6043 = vst [vmem:[#allocation34_spill] sm:$0xff] %v4837_v0 }
 0x174   :  { %v576_v13 = vld [vmem:[%s5849_s5 + $0x38] sm:$0xff] }
 0x175   :  { %v226_v14 = vpack.c.bf16 %v220_v12, %v218_v9  ;;  %6033 = vst [vmem:[#allocation24_spill] sm:$0xff] %v4737_v3  ;;  %v4745_v9 = vsub.f32 %v593_v5, %v4727_v7  ;;  %v4747_v12 = vand.u32 4294901760, %v592_v11  ;;  %3805 = vmatpush3.msra.mxu0 %v4737_v3  ;;  %v587_v5 = vld [vmem:[%s5849_s5 + $0x90] sm:$0xff] }
 0x177   :  { %464 = vmatprep.mubr.bf16.mxu1 %v226_v14  ;;  %6034 = vst [vmem:[#allocation25_spill] sm:$0xff] %v4747_v12  ;;  %v4755_v14 = vsub.f32 %v577_v2, %v4737_v3  ;;  %3806 = vmatprep.subr.mxu0 %v4747_v12  ;;  %v4845_v2 = vsub.f32 %v588_v49, %v4827_v56  ;;  %v510_v3 = vpop.permute.xlu0 %509 }
 0x178   :  { %465 = vmatmul.mubr.bf16.vlgmr.msra.gmra.mxu1 %v225_v15  ;;  %v4757_v15 = vand.u32 4294901760, %v576_v13 }
 0x179   :  { %3861 = vmatpush3.msra.mxu1 %v4615_v33 }
 0x17a   :  { %3862 = vmatprep.subr.mxu1 %v4625_v36  ;;  %6035 = vst [vmem:[#allocation26_spill] sm:$0xff] %v4757_v15  ;;  %3807 = vmatpush3.msra.mxu0 %v4757_v15 }
 0x17b   :  { %3863 = vmatpush3.msra.mxu1 %v4635_v40 }
 0x17c   :  { %v208_v16 = vpop.f32.mrf.mxu0  ;;  %3864 = vmatprep.subr.mxu1 %v4645_v43 }
 0x17d   :  { %v221_v22 = vmax.f32 %v208_v16, 0.0  ;;  %3865 = vmatpush3.msra.mxu1 %v4655_v46  ;;  %v591_v16 = vld [vmem:[%s5849_s5 + $0xb0] sm:$0xff] }
 0x17e   :  { %v210_v17 = vpop.f32.mrf.mxu0  ;;  %3866 = vmatprep.subr.mxu1 %v4665_v50 }
 0x17f   :  { %v222_v20 = vmax.f32 %v210_v17, 0.0  ;;  %3867 = vmatpush3.msra.mxu1 %v4672_v52  ;;  %v4765_v17 = vsub.f32 %v592_v11, %v4747_v12  ;;  %v4847_v11 = vand.u32 4294901760, %v587_v5 }
 0x180   :  { %v212_v18 = vpop.f32.mrf.mxu0  ;;  %3868 = vmatprep.subr.mxu1 %v4680_v54 }
 0x181   :  { %v223_v10 = vmax.f32 %v212_v18, 0.0  ;;  %3869 = vmatpush3.msra.mxu1 %v4696_v59  ;;  %v4767_v18 = vand.u32 4294901760, %v591_v16  ;;  %6044 = vst [vmem:[#allocation35_spill] sm:$0xff] %v4847_v11 }
 0x182   :  { %v214_v19 = vpop.f32.mrf.mxu0  ;;  %3870 = vmatprep.subr.mxu1 %v4705_v62 }
 0x183   :  { %v224_v21 = vmax.f32 %v214_v19, 0.0  ;;  %v227_v24 = vpack.c.bf16 %v223_v10, %v221_v22  ;;  %3871 = vmatpush3.msra.mxu1 %v4715_v1  ;;  %6036 = vst [vmem:[#allocation27_spill] sm:$0xff] %v4767_v18  ;;  %v575_v10 = vld [vmem:[%s5849_s5 + $0x30] sm:$0xff]  ;;  %v4775_v19 = vsub.f32 %v576_v13, %v4757_v15  ;;  %v4785_v22 = vsub.f32 %v591_v16, %v4767_v18 }
 0x184   :  { %3872 = vmatprep.subr.mxu1 %v4725_v6  ;;  %3808 = vmatprep.subr.mxu0 %v4767_v18  ;;  %v571_v13 = vld [vmem:[%s5849_s5 + $0x10] sm:$0xff]  ;;  %v4855_v16 = vsub.f32 %v572_v58, %v4837_v0  ;;  %v4877_v58 = vand.u32 4294901760, %v570_v39 }
 0x185   :  { %v228_v23 = vpack.c.bf16 %v224_v21, %v222_v20  ;;  %3873 = vmatpush3.msra.mxu1 %v4735_v8  ;;  %v4777_v20 = vand.u32 4294901760, %v575_v10  ;;  %v590_v21 = vld [vmem:[%s5849_s5 + $0xa8] sm:$0xff] }
 0x186   :  { %3874 = vmatprep.subr.mxu1 %v4745_v9  ;;  %6048 = vst [vmem:[#allocation39_spill] sm:$0xff] %v4877_v58 }
 0x187   :  { %474 = vmatprep.mubr.bf16.mxu1 %v228_v23  ;;  %3875 = vmatpush3.msra.mxu1 %v4755_v14  ;;  %6037 = vst [vmem:[#allocation28_spill] sm:$0xff] %v4777_v20  ;;  %v4787_v23 = vand.u32 4294901760, %v590_v21  ;;  %v4795_v25 = vsub.f32 %v575_v10, %v4777_v20  ;;  %v4857_v10 = vand.u32 4294901760, %v571_v13 }
 0x188   :  { %475 = vmatmul.mubr.bf16.gmra.mxu1 %v227_v24  ;;  %3876 = vmatprep.subr.mxu1 %v4765_v17  ;;  %v574_v24 = vld [vmem:[%s5849_s5 + $0x28] sm:$0xff] }
 0x189   :  { %6038 = vst [vmem:[#allocation29_spill] sm:$0xff] %v4787_v23  ;;  %3877 = vmatpush3.msra.mxu1 %v4775_v19  ;;  %v4797_v27 = vand.u32 4294901760, %v574_v24  ;;  %3809 = vmatpush3.msra.mxu0 %v4777_v20  ;;  %v4805_v32 = vsub.f32 %v590_v21, %v4787_v23  ;;  %6045 = vst [vmem:[#allocation36_spill] sm:$0xff] %v4857_v10  ;;  %v586_v21 = vld [vmem:[%s5849_s5 + $0x88] sm:$0xff]  ;;  %v4875_v49 = vsub.f32 %v571_v13, %v4857_v10  ;;  %v569_v13 = vld [vmem:[%s5849_s5] sm:$0xff] }
 0x18a   :  { %3878 = vmatprep.subr.mxu1 %v4785_v22  ;;  %3810 = vmatprep.subr.mxu0 %v4787_v23  ;;  %v4867_v29 = vand.u32 4294901760, %v586_v21 }
 0x18b   :  { %6039 = vst [vmem:[#allocation30_spill] sm:$0xff] %v4797_v27  ;;  %3879 = vmatpush3.msra.mxu1 %v4795_v25  ;;  %v4815_v42 = vsub.f32 %v574_v24, %v4797_v27  ;;  %3811 = vmatpush3.msra.mxu0 %v4797_v27  ;;  %v4865_v24 = vsub.f32 %v587_v5, %v4847_v11  ;;  %6047 = vst [vmem:[#allocation38_spill] sm:$0xff] %v4875_v49  ;;  %v585_v5 = vld [vmem:[%s5849_s5 + $0x80] sm:$0xff] }
 0x18c   :  { %3880 = vmatprep.subr.mxu1 %v4805_v32  ;;  %3812 = vmatprep.subr.mxu0 %v4807_v35  ;;  %6046 = vst [vmem:[#allocation37_spill] sm:$0xff] %v4867_v29  ;;  %v4885_v47 = vsub.f32 %v586_v21, %v4867_v29  ;;  %v4887_v37 = vand.u32 4294901760, %v585_v5 }
 0x18d   :  { %3881 = vmatpush3.msra.mxu1 %v4815_v42  ;;  %3813 = vmatpush3.msra.mxu0 %v4817_v45  ;;  %v55_v45 = vld [vmem:[%s5848_s4] ss:$4 sm:$0x3] }
 0x18e   :  { %3882 = vmatprep.subr.mxu1 %v4825_v53  ;;  %3814 = vmatprep.subr.mxu0 %v4827_v56  ;;  %6049 = vst [vmem:[#allocation40_spill] sm:$0xff] %v4885_v47  ;;  %6050 = vst [vmem:[#allocation41_spill] sm:$0xff] %v4887_v37  ;;  %v4902_v21 = vsub.f32 %v585_v5, %v4887_v37 }
 0x18f   :  { %3883 = vmatpush3.msra.mxu1 %v4835_v61  ;;  %3815 = vmatpush3.msra.mxu0 %v4837_v0  ;;  %v4897_v0 = vand.u32 4294901760, %v569_v13 }
 0x190   :  { %3884 = vmatprep.subr.mxu1 %v4845_v2  ;;  %3816 = vmatprep.subr.mxu0 %v4847_v11  ;;  %v4895_v11 = vsub.f32 %v570_v39, %v4877_v58  ;;  %6053 = vst [vmem:[#allocation44_spill] sm:$0xff] %v4902_v21  ;;  %v4912_v39 = vand.u32 4294901760, %v4606_v30 }
 0x191   :  { %3885 = vmatpush3.msra.mxu1 %v4855_v16  ;;  %3817 = vmatpush3.msra.mxu0 %v4857_v10  ;;  %6052 = vst [vmem:[#allocation43_spill] sm:$0xff] %v4897_v0 }
 0x192   :  { %3886 = vmatprep.subr.mxu1 %v4865_v24  ;;  %3818 = vmatprep.subr.mxu0 %v4867_v29  ;;  %6051 = vst [vmem:[#allocation42_spill] sm:$0xff] %v4895_v11  ;;  %v4907_v29 = vsub.f32 %v569_v13, %v4897_v0  ;;  %6055 = vst [vmem:[#allocation46_spill] sm:$0xff] %v4912_v39  ;;  %v829_v5 = vsub.f32 %v4606_v30, %v4912_v39 }
 0x193   :  { %3887 = vmatpush3.msra.mxu1 %v4875_v49  ;;  %3819 = vmatpush3.msra.mxu0 %v4877_v58  ;;  %v6057_v58 = vlaneseq }
 0x194   :  { %3888 = vmatprep.subr.mxu1 %v4885_v47  ;;  %3820 = vmatprep.subr.mxu0 %v4887_v37  ;;  %6054 = vst [vmem:[#allocation45_spill] sm:$0xff] %v4907_v29  ;;  %v4918_v37 = vand.u32 4294901760, %v829_v5 }
 0x195   :  { %3889 = vmatpush3.msra.mxu1 %v4895_v11  ;;  %3821 = vmatpush3.msra.mxu0 %v4897_v0  ;;  %v4922_v10 = vshrl.u32 %v6057_v58, 7 }
 0x196   :  { %3890 = vmatprep.subr.mxu1 %v4902_v21  ;;  %6056 = vst [vmem:[#allocation47_spill] sm:$0xff] %v4918_v37  ;;  %3825 = vmatprep.subr.mxu0 %v4918_v37 }
 0x197   :  { %3891 = vmatpush3.msra.mxu1 %v4907_v29  ;;  %6058 = vst [vmem:[#allocation48_spill] sm:$0xff] %v4922_v10  ;;  %v4925_v56 = vsub.s32 0, %v4922_v10  ;;  %v4931_v27 = vsub.s32 1, %v4922_v10 }
 0x198   :  { %3930 = vmatprep.subr.mxu1 %v4912_v39  ;;  %v4261_v39 = vpop.permute.xlu1 %4260 }
 0x199   :  { %6059 = vst [vmem:[#allocation49_spill] sm:$0xff] %v4925_v56  ;;  %6060 = vst [vmem:[#allocation50_spill] sm:$0xff] %v4931_v27  ;;  %v265_v5 = vrot.slane %v55_v45, %v4925_v56  ;;  %v4263_v37 = vunpack.i.h.bf16 %v4261_v39  ;;  %v269_v23 = vrot.slane %v55_v45, %v4931_v27  ;;  %v4262_v18 = vunpack.i.l.bf16 %v4261_v39 }
 0x19c   :  { %v515_v60 = vpop.permute.xlu1 %514 }
 0x238   :  { %v466_v13 = vpop.f32.mrf.mxu1 }
 0x239   :  { %v4937_v20 = vadd.f32 %v466_v13, %v265_v5 }
 0x23a   :  { %v468_v0 = vpop.f32.mrf.mxu1 }
 0x23b   :  { %6062 = vst [vmem:[#allocation52_spill] sm:$0xff] %v4937_v20  ;;  %v4946_v56 = vadd.f32 %v468_v0, %v269_v23 }
 0x23c   :  { %v470_v35 = vpop.f32.mrf.mxu1 }
 0x23d   :  { %v4934_v30 = vadd.f32 %v470_v35, %v265_v5  ;;  %6065 = vst [vmem:[#allocation55_spill] sm:$0xff] %v4946_v56  ;;  %v4949_v35 = vmul.f32 %v4262_v18, %v4937_v20 }
 0x23e   :  { %v472_v58 = vpop.f32.mrf.mxu1 }
 0x23f   :  { %6061 = vst [vmem:[#allocation51_spill] sm:$0xff] %v4934_v30  ;;  %v4939_v15 = vadd.f32 %v472_v58, %v269_v23  ;;  %v4942_v7 = vmul.f32 %v4263_v37, %v4934_v30 }
 0x241   :  { %6063 = vst [vmem:[#allocation53_spill] sm:$0xff] %v4939_v15  ;;  %v520_v39 = vmul.f32 %v4263_v37, %v4939_v15  ;;  %v525_v58 = vadd.f32 %v4942_v7, %v4949_v35 }
 0x248   :  { %v476_v12 = vpop.f32.mrf.mxu1 }
 0x249   :  { %v4944_v10 = vadd.f32 %v476_v12, %v265_v5  ;;  %v518_v12 = vmul.f32 %v4262_v18, %v4946_v56  ;;  %v546_v18 = vmul.f32 %v520_v39, %v4939_v15  ;;  %v5044_v15 = vand.u32 4294901760, %v4696_v59 }
 0x24a   :  { %v478_v4 = vpop.f32.mrf.mxu1 }
 0x24b   :  { %6064 = vst [vmem:[#allocation54_spill] sm:$0xff] %v4944_v10  ;;  %v4951_v63 = vadd.f32 %v478_v4, %v269_v23  ;;  %v4954_v45 = vmul.f32 %v510_v3, %v4944_v10  ;;  %v534_v51 = vadd.f32 %v520_v39, %v518_v12  ;;  %v544_v38 = vmul.f32 %v518_v12, %v4946_v56 }
 0x24c   :  { %v480_v13 = vpop.f32.mrf.mxu1  ;;  %6081 = vst [vmem:[#allocation71_spill] sm:$0xff] %v5044_v15  ;;  %v5052_v56 = vand.u32 4294901760, %v4705_v62 }
 0x24d   :  { %6066 = vst [vmem:[#allocation56_spill] sm:$0xff] %v4951_v63  ;;  %v4959_v27 = vadd.f32 %v480_v13, %v265_v5  ;;  %v522_v0 = vmul.f32 %v510_v3, %v4951_v63  ;;  %v526_v4 = vadd.f32 %v525_v58, %v4954_v45  ;;  %v560_v28 = vadd.f32 %v546_v18, %v544_v38 }
 0x24e   :  { %v482_v57 = vpop.f32.mrf.mxu1  ;;  %6083 = vst [vmem:[#allocation73_spill] sm:$0xff] %v5052_v56 }
 0x24f   :  { %6067 = vst [vmem:[#allocation57_spill] sm:$0xff] %v4959_v27  ;;  %v4965_v55 = vmul.f32 %v515_v60, %v4959_v27  ;;  %v4967_v48 = vadd.f32 %v482_v57, %v269_v23  ;;  %v535_v44 = vadd.f32 %v534_v51, %v522_v0  ;;  %v548_v58 = vmul.f32 %v522_v0, %v4951_v63 }
 0x251   :  { %6068 = vst [vmem:[#allocation58_spill] sm:$0xff] %v4967_v48  ;;  %v527_v37 = vadd.f32 %v526_v4, %v4965_v55  ;;  %v524_v5 = vmul.f32 %v515_v60, %v4967_v48  ;;  %v561_v4 = vadd.f32 %v560_v28, %v548_v58  ;;  %v5011_v58 = vand.u32 4294901760, %v4655_v46 }
 0x253   :  { %v528_v13 = vrot.slane %v527_v37, 4  ;;  %v536_v41 = vadd.f32 %v535_v44, %v524_v5  ;;  %v550_v57 = vmul.f32 %v524_v5, %v4967_v48  ;;  %6074 = vst [vmem:[#allocation64_spill] sm:$0xff] %v5011_v58  ;;  %v5036_v48 = vand.u32 4294901760, %v4680_v54 }
 0x255   :  { %v529_v3 = vadd.f32 %v528_v13, %v527_v37  ;;  %v537_v34 = vrot.slane %v536_v41, 4  ;;  %v562_v60 = vadd.f32 %v561_v4, %v550_v57  ;;  %v5020_v4 = vand.u32 4294901760, %v4665_v50  ;;  %6079 = vst [vmem:[#allocation69_spill] sm:$0xff] %v5036_v48 }
 0x257   :  { %v530_v31 = vrot.slane %v529_v3, 2  ;;  %v538_v26 = vadd.f32 %v537_v34, %v536_v41  ;;  %v563_v37 = vrot.slane %v562_v60, 4  ;;  %v4994_v41 = vand.u32 4294901760, %v4635_v40  ;;  %6075 = vst [vmem:[#allocation65_spill] sm:$0xff] %v5020_v4 }
 0x258   :  { %v850_v63 = vsub.f32 %v4665_v50, %v5020_v4 }
 0x259   :  { %v531_v23 = vadd.f32 %v530_v31, %v529_v3  ;;  %v539_v51 = vrot.slane %v538_v26, 2  ;;  %v564_v38 = vadd.f32 %v563_v37, %v562_v60  ;;  %v4987_v31 = vand.u32 4294901760, %v4615_v33  ;;  %6072 = vst [vmem:[#allocation62_spill] sm:$0xff] %v4994_v41 }
 0x25a   :  { %v5028_v37 = vand.u32 4294901760, %v4672_v52 }
 0x25b   :  { %v532_v29 = vrot.slane %v531_v23, 1  ;;  %v540_v21 = vadd.f32 %v539_v51, %v538_v26  ;;  %6070 = vst [vmem:[#allocation60_spill] sm:$0xff] %v4987_v31  ;;  %v4990_v26 = vand.u32 4294901760, %v4625_v36  ;;  %v565_v3 = vrot.slane %v564_v38, 2 }
 0x25c   :  { %6077 = vst [vmem:[#allocation67_spill] sm:$0xff] %v5028_v37 }
 0x25d   :  { %v533_v11 = vadd.f32 %v532_v29, %v531_v23  ;;  %v541_v39 = vrot.slane %v540_v21, 1  ;;  %6071 = vst [vmem:[#allocation61_spill] sm:$0xff] %v4990_v26  ;;  %v717_v29 = vsub.f32 %v4615_v33, %v4987_v31  ;;  %v836_v18 = vsub.f32 %v4625_v36, %v4990_v26 }
 0x25e   :  { %v724_v23 = vsub.f32 %v4635_v40, %v4994_v41 }
 0x25f   :  { %v4975_v44 = vand.u32 4294901760, %v533_v11  ;;  %v542_v12 = vadd.f32 %v541_v39, %v540_v21  ;;  %v5001_v21 = vand.u32 4294901760, %v4645_v43  ;;  %v5025_v39 = vand.u32 4294901760, %v717_v29 }
 0x260   :  { %v5041_v29 = vand.u32 4294901760, %v724_v23 }
 0x261   :  { %6069 = vst [vmem:[#allocation59_spill] sm:$0xff] %v4975_v44  ;;  %v4978_v0 = vsub.f32 %v533_v11, %v4975_v44  ;;  %v4980_v13 = vand.u32 4294901760, %v542_v12  ;;  %6073 = vst [vmem:[#allocation63_spill] sm:$0xff] %v5001_v21  ;;  %v843_v51 = vsub.f32 %v4645_v43, %v5001_v21 }
 0x262   :  { %6076 = vst [vmem:[#allocation66_spill] sm:$0xff] %v5025_v39  ;;  %6080 = vst [vmem:[#allocation70_spill] sm:$0xff] %v5041_v29 }
 0x263   :  { %v5933_v34 = vand.u32 4294901760, %v4978_v0  ;;  %v4984_v28 = vsub.f32 %v542_v12, %v4980_v13  ;;  %v731_v12 = vsub.f32 %v4655_v46, %v5011_v58 }
 0x265   :  { %1075 = vmatprep.mubr.f32.mxu1 %v4984_v28  ;;  %v5934_v11 = vand.u32 4294901760, %v4984_v28  ;;  %v706_v5 = vsub.f32 %v4978_v0, %v5933_v34  ;;  %v5061_v23 = vand.u32 4294901760, %v731_v12 }
 0x266   :  { %1078 = vmatmul.mubr.f32.vlgmr.msra.gmra.mxu1 %v4978_v0 }
 0x267   :  { %3931 = vmatpush3.msra.mxu1 %v4987_v31  ;;  %1352 = vmatprep.mubr.f32.mxu1 %v4980_v13  ;;  %v700_v57 = vsub.f32 %v4984_v28, %v5934_v11  ;;  %v707_v34 = vand.u32 4294901760, %v706_v5  ;;  %v5033_v11 = vand.u32 4294901760, %v836_v18  ;;  %v738_v5 = vsub.f32 %v4672_v52, %v5028_v37  ;;  %6085 = vst [vmem:[#allocation75_spill] sm:$0xff] %v5061_v23 }
 0x268   :  { %3932 = vmatprep.subr.mxu1 %v4990_v26  ;;  %v5049_v18 = vand.u32 4294901760, %v843_v51  ;;  %v5070_v51 = vand.u32 4294901760, %v850_v63  ;;  %v6164_v26 = vld [vmem:[#allocation34_spill] sm:$0xff] }
 0x269   :  { %3933 = vmatpush3.msra.mxu1 %v4994_v41  ;;  %v701_v60 = vand.u32 4294901760, %v700_v57  ;;  %6078 = vst [vmem:[#allocation68_spill] sm:$0xff] %v5033_v11  ;;  %v566_v57 = vadd.f32 %v565_v3, %v564_v38  ;;  %v5055_v38 = vand.u32 4294901760, %v4715_v1  ;;  %v857_v3 = vsub.f32 %v4680_v54, %v5036_v48 }
 0x26a   :  { %3934 = vmatprep.subr.mxu1 %v5001_v21  ;;  %6082 = vst [vmem:[#allocation72_spill] sm:$0xff] %v5049_v18  ;;  %6087 = vst [vmem:[#allocation77_spill] sm:$0xff] %v5070_v51  ;;  %v5093_v41 = vand.u32 4294901760, %v4755_v14 }
 0x26b   :  { %3935 = vmatpush3.msra.mxu1 %v5011_v58  ;;  %702 = vmatprep.mubr.f32.mxu0 %v701_v60  ;;  %6084 = vst [vmem:[#allocation74_spill] sm:$0xff] %v5055_v38  ;;  %v5064_v60 = vand.u32 4294901760, %v4725_v6  ;;  %v752_v12 = vsub.f32 %v4715_v1, %v5055_v38  ;;  %v567_v58 = vrot.slane %v566_v57, 1  ;;  %v5090_v21 = vand.u32 4294901760, %v857_v3 }
 0x26c   :  { %3936 = vmatprep.subr.mxu1 %v5020_v4  ;;  %708 = vmatmul.mubr.f32.vlgmr.msra.gmra.mxu0 %v707_v34  ;;  %v745_v34 = vsub.f32 %v4696_v59, %v5044_v15  ;;  %v5073_v4 = vand.u32 4294901760, %v4735_v8  ;;  %6092 = vst [vmem:[#allocation82_spill] sm:$0xff] %v5093_v41 }
 0x26d   :  { %3826 = vmatpush3.msra.mxu0 %v5025_v39  ;;  %3937 = vmatpush3.msra.mxu1 %v5028_v37  ;;  %6086 = vst [vmem:[#allocation76_spill] sm:$0xff] %v5064_v60  ;;  %v864_v37 = vsub.f32 %v4705_v62, %v5052_v56  ;;  %v5081_v39 = vand.u32 4294901760, %v738_v5  ;;  %v871_v63 = vsub.f32 %v4725_v6, %v5064_v60  ;;  %6091 = vst [vmem:[#allocation81_spill] sm:$0xff] %v5090_v21 }
 0x26e   :  { %3827 = vmatprep.subr.mxu0 %v5033_v11  ;;  %938 = vmatprep.mubr.f32.mxu0 %v4980_v13  ;;  %6088 = vst [vmem:[#allocation78_spill] sm:$0xff] %v5073_v4  ;;  %v5084_v11 = vand.u32 4294901760, %v4745_v9  ;;  %v759_v5 = vsub.f32 %v4735_v8, %v5073_v4 }
 0x26f   :  { %3938 = vmatprep.subr.mxu1 %v5036_v48  ;;  %3828 = vmatpush3.msra.mxu0 %v5041_v29  ;;  %6089 = vst [vmem:[#allocation79_spill] sm:$0xff] %v5081_v39  ;;  %v5099_v29 = vand.u32 4294901760, %v745_v34  ;;  %v5105_v3 = vand.u32 4294901760, %v864_v37  ;;  %v545_v34 = vmul.f32 %v4942_v7, %v4934_v30  ;;  %v5121_v37 = vand.u32 4294901760, %v871_v63 }
 0x270   :  { %6090 = vst [vmem:[#allocation80_spill] sm:$0xff] %v5084_v11  ;;  %3939 = vmatpush3.msra.mxu1 %v5044_v15  ;;  %3829 = vmatprep.subr.mxu0 %v5049_v18  ;;  %v878_v48 = vsub.f32 %v4745_v9, %v5084_v11  ;;  %v5108_v18 = vand.u32 4294901760, %v4765_v17  ;;  %v5110_v15 = vand.u32 4294901760, %v752_v12  ;;  %v5126_v12 = vand.u32 4294901760, %v4785_v22 }
 0x271   :  { %3940 = vmatprep.subr.mxu1 %v5052_v56  ;;  %3830 = vmatpush3.msra.mxu0 %v5061_v23  ;;  %6093 = vst [vmem:[#allocation83_spill] sm:$0xff] %v5099_v29  ;;  %6094 = vst [vmem:[#allocation84_spill] sm:$0xff] %v5105_v3  ;;  %v766_v56 = vsub.f32 %v4755_v14, %v5093_v41  ;;  %v5128_v23 = vand.u32 4294901760, %v759_v5  ;;  %v5131_v7 = vand.u32 4294901760, %v4795_v25 }
 0x272   :  { %3941 = vmatpush3.msra.mxu1 %v5055_v38  ;;  %3831 = vmatprep.subr.mxu0 %v5070_v51  ;;  %6095 = vst [vmem:[#allocation85_spill] sm:$0xff] %v5108_v18  ;;  %6096 = vst [vmem:[#allocation86_spill] sm:$0xff] %v5110_v15  ;;  %v5119_v38 = vand.u32 4294901760, %v4775_v19  ;;  %v568_v51 = vadd.f32 %v567_v58, %v566_v57  ;;  %v885_v30 = vsub.f32 %v4765_v17, %v5108_v18 }
 0x273   :  { %3942 = vmatprep.subr.mxu1 %v5064_v60  ;;  %3832 = vmatpush3.msra.mxu0 %v5081_v39  ;;  %6098 = vst [vmem:[#allocation88_spill] sm:$0xff] %v5121_v37  ;;  %6099 = vst [vmem:[#allocation89_spill] sm:$0xff] %v5126_v12  ;;  %v543_v63 = vmul.f32 %v4949_v35, %v4937_v20  ;;  %v547_v58 = vmul.f32 %v4954_v45, %v4944_v10  ;;  %v5141_v57 = vand.u32 4294901760, %v878_v48  ;;  %v6160_v39 = vld [vmem:[#allocation30_spill] sm:$0xff]  ;;  %v6161_v60 = vld [vmem:[#allocation31_spill] sm:$0xff] }
 0x274   :  { %6097 = vst [vmem:[#allocation87_spill] sm:$0xff] %v5119_v38  ;;  %3943 = vmatpush3.msra.mxu1 %v5073_v4  ;;  %3833 = vmatprep.subr.mxu0 %v5090_v21  ;;  %6100 = vst [vmem:[#allocation90_spill] sm:$0xff] %v5128_v23  ;;  %v773_v5 = vsub.f32 %v4775_v19, %v5119_v38  ;;  %v5148_v21 = vand.u32 4294901760, %v4805_v32  ;;  %v5150_v35 = vand.u32 4294901760, %v766_v56  ;;  %v5167_v56 = vand.u32 4294901760, %v885_v30  ;;  %v6159_v4 = vld [vmem:[#allocation29_spill] sm:$0xff] }
 0x275   :  { %6101 = vst [vmem:[#allocation91_spill] sm:$0xff] %v5131_v7  ;;  %3944 = vmatprep.subr.mxu1 %v5084_v11  ;;  %3834 = vmatpush3.msra.mxu0 %v5099_v29  ;;  %6102 = vst [vmem:[#allocation92_spill] sm:$0xff] %v5141_v57  ;;  %v892_v45 = vsub.f32 %v4785_v22, %v5126_v12  ;;  %v780_v10 = vsub.f32 %v4795_v25, %v5131_v7  ;;  %v6158_v11 = vld [vmem:[#allocation28_spill] sm:$0xff] }
 0x276   :  { %3945 = vmatpush3.msra.mxu1 %v5093_v41  ;;  %3835 = vmatprep.subr.mxu0 %v5105_v3  ;;  %6103 = vst [vmem:[#allocation93_spill] sm:$0xff] %v5148_v21  ;;  %6104 = vst [vmem:[#allocation94_spill] sm:$0xff] %v5150_v35  ;;  %v551_v48 = vadd.f32 %v545_v34, %v543_v63  ;;  %v549_v20 = vmul.f32 %v4965_v55, %v4959_v27  ;;  %v5161_v3 = vand.u32 4294901760, %v4815_v42 }
 0x277   :  { %3946 = vmatprep.subr.mxu1 %v5108_v18  ;;  %3836 = vmatpush3.msra.mxu0 %v5110_v15  ;;  %v5163_v41 = vand.u32 4294901760, %v568_v51  ;;  %6107 = vst [vmem:[#allocation97_spill] sm:$0xff] %v5167_v56  ;;  %v5170_v34 = vand.u32 4294901760, %v4825_v53  ;;  %v899_v55 = vsub.f32 %v4805_v32, %v5148_v21  ;;  %v5176_v27 = vand.u32 4294901760, %v773_v5  ;;  %v6157_v18 = vld [vmem:[#allocation27_spill] sm:$0xff] }
 0x278   :  { %6105 = vst [vmem:[#allocation95_spill] sm:$0xff] %v5161_v3  ;;  %3947 = vmatpush3.msra.mxu1 %v5119_v38  ;;  %3837 = vmatprep.subr.mxu0 %v5121_v37  ;;  %v552_v63 = vadd.f32 %v551_v48, %v547_v58  ;;  %v5179_v15 = vand.u32 4294901760, %v4835_v61  ;;  %v787_v30 = vsub.f32 %v4815_v42, %v5161_v3  ;;  %v5185_v37 = vand.u32 4294901760, %v892_v45 }
 0x279   :  { %6106 = vst [vmem:[#allocation96_spill] sm:$0xff] %v5163_v41  ;;  %6108 = vst [vmem:[#allocation98_spill] sm:$0xff] %v5170_v34  ;;  %3948 = vmatprep.subr.mxu1 %v5126_v12  ;;  %3838 = vmatpush3.msra.mxu0 %v5128_v23  ;;  %v5188_v58 = vand.u32 4294901760, %v4845_v2  ;;  %v5190_v48 = vand.u32 4294901760, %v780_v10  ;;  %v906_v5 = vsub.f32 %v4825_v53, %v5170_v34  ;;  %v5197_v12 = vand.u32 4294901760, %v4855_v16 }
 0x27a   :  { %6109 = vst [vmem:[#allocation99_spill] sm:$0xff] %v5176_v27  ;;  %6110 = vst [vmem:[#allocation100_spill] sm:$0xff] %v5179_v15  ;;  %3949 = vmatpush3.msra.mxu1 %v5131_v7  ;;  %3839 = vmatprep.subr.mxu0 %v5141_v57  ;;  %v553_v23 = vadd.f32 %v552_v63, %v549_v20  ;;  %v794_v45 = vsub.f32 %v4835_v61, %v5179_v15  ;;  %v5206_v10 = vand.u32 4294901760, %v899_v55 }
 0x27b   :  { %6111 = vst [vmem:[#allocation101_spill] sm:$0xff] %v5185_v37  ;;  %6112 = vst [vmem:[#allocation102_spill] sm:$0xff] %v5188_v58  ;;  %3950 = vmatprep.subr.mxu1 %v5148_v21  ;;  %3840 = vmatpush3.msra.mxu0 %v5150_v35  ;;  %v5202_v57 = vsub.f32 %v568_v51, %v5163_v41  ;;  %v5209_v20 = vand.u32 4294901760, %v4865_v24  ;;  %v913_v63 = vsub.f32 %v4845_v2, %v5188_v58  ;;  %v6165_v41 = vld [vmem:[#allocation35_spill] sm:$0xff] }
 0x27c   :  { %6113 = vst [vmem:[#allocation103_spill] sm:$0xff] %v5190_v48  ;;  %6114 = vst [vmem:[#allocation104_spill] sm:$0xff] %v5197_v12  ;;  %3951 = vmatpush3.msra.mxu1 %v5161_v3  ;;  %3841 = vmatprep.subr.mxu0 %v5167_v56  ;;  %v5215_v35 = vand.u32 4294901760, %v787_v30  ;;  %v801_v51 = vsub.f32 %v4855_v16, %v5197_v12  ;;  %v5222_v55 = vand.u32 4294901760, %v4875_v49  ;;  %v5224_v56 = vand.u32 4294901760, %v906_v5  ;;  %v6122_v5 = vld [vmem:[#allocation42_spill] sm:$0xff] }
 0x27d   :  { %6115 = vst [vmem:[#allocation105_spill] sm:$0xff] %v5206_v10  ;;  %6116 = vst [vmem:[#allocation106_spill] sm:$0xff] %v5209_v20  ;;  %3952 = vmatprep.subr.mxu1 %v5170_v34  ;;  %3842 = vmatpush3.msra.mxu0 %v5176_v27  ;;  %v920_v3 = vsub.f32 %v4865_v24, %v5209_v20  ;;  %v554_v34 = vrot.slane %v553_v23, 4  ;;  %v5231_v30 = vand.u32 4294901760, %v4885_v47  ;;  %v5233_v27 = vand.u32 4294901760, %v794_v45  ;;  %v6125_v45 = vld [vmem:[#allocation44_spill] sm:$0xff] }
 0x27e   :  { %6117 = vst [vmem:[#allocation107_spill] sm:$0xff] %v5215_v35  ;;  %3953 = vmatpush3.msra.mxu1 %v5179_v15  ;;  %3843 = vmatprep.subr.mxu0 %v5185_v37  ;;  %6118 = vst [vmem:[#allocation108_spill] sm:$0xff] %v5222_v55  ;;  %v5239_v15 = vand.u32 4294901760, %v6122_v5  ;;  %v5241_v21 = vand.u32 4294901760, %v913_v63  ;;  %v5250_v37 = vand.u32 4294901760, %v801_v51  ;;  %v6128_v63 = vld [vmem:[#allocation45_spill] sm:$0xff] }
 0x27f   :  { %6119 = vst [vmem:[#allocation109_spill] sm:$0xff] %v5224_v56  ;;  %3954 = vmatprep.subr.mxu1 %v5188_v58  ;;  %3844 = vmatpush3.msra.mxu0 %v5190_v48  ;;  %6120 = vst [vmem:[#allocation110_spill] sm:$0xff] %v5231_v30  ;;  %v808_v58 = vsub.f32 %v4875_v49, %v5222_v55  ;;  %v5248_v48 = vand.u32 4294901760, %v6125_v45  ;;  %v5259_v7 = vand.u32 4294901760, %v920_v3  ;;  %v6131_v51 = vand.u32 4294901760, %v5202_v57 }
 0x280   :  { %6121 = vst [vmem:[#allocation111_spill] sm:$0xff] %v5233_v27  ;;  %3955 = vmatpush3.msra.mxu1 %v5197_v12  ;;  %3845 = vmatprep.subr.mxu0 %v5206_v10  ;;  %6123 = vst [vmem:[#allocation112_spill] sm:$0xff] %v5239_v15  ;;  %v927_v10 = vsub.f32 %v4885_v47, %v5231_v30  ;;  %v5257_v12 = vand.u32 4294901760, %v6128_v63  ;;  %v6169_v47 = vld [vmem:[#allocation41_spill] sm:$0xff] }
 0x281   :  { %6124 = vst [vmem:[#allocation113_spill] sm:$0xff] %v5241_v21  ;;  %3956 = vmatprep.subr.mxu1 %v5209_v20  ;;  %3846 = vmatpush3.msra.mxu0 %v5215_v35  ;;  %6126 = vst [vmem:[#allocation114_spill] sm:$0xff] %v5248_v48  ;;  %v815_v35 = vsub.f32 %v6122_v5, %v5239_v15  ;;  %v555_v20 = vadd.f32 %v554_v34, %v553_v23  ;;  %v5272_v3 = vand.u32 4294901760, %v808_v58  ;;  %v6135_v58 = vld [vmem:[#allocation8_spill] sm:$0xff]  ;;  %v6168_v5 = vld [vmem:[#allocation39_spill] sm:$0xff] }
 0x282   :  { %6127 = vst [vmem:[#allocation115_spill] sm:$0xff] %v5250_v37  ;;  %3957 = vmatpush3.msra.mxu1 %v5222_v55  ;;  %3847 = vmatprep.subr.mxu0 %v5224_v56  ;;  %6129 = vst [vmem:[#allocation116_spill] sm:$0xff] %v5257_v12  ;;  %v1563_v38 = vsub.f32 %v5202_v57, %v6131_v51  ;;  %v934_v56 = vsub.f32 %v6125_v45, %v5248_v48  ;;  %v5278_v34 = vand.u32 4294901760, %v927_v10  ;;  %v6156_v55 = vld [vmem:[#allocation26_spill] sm:$0xff]  ;;  %v6167_v45 = vld [vmem:[#allocation37_spill] sm:$0xff] }
 0x283   :  { %6130 = vst [vmem:[#allocation117_spill] sm:$0xff] %v5259_v7  ;;  %3958 = vmatprep.subr.mxu1 %v5231_v30  ;;  %3848 = vmatpush3.msra.mxu0 %v5233_v27  ;;  %6132 = vst [vmem:[#allocation118_spill] sm:$0xff] %v5272_v3  ;;  %v822_v23 = vsub.f32 %v6128_v63, %v5257_v12  ;;  %v5282_v51 = vand.u32 4294901760, %v815_v35  ;;  %v6153_v30 = vld [vmem:[#allocation23_spill] sm:$0xff]  ;;  %v6166_v63 = vld [vmem:[#allocation36_spill] sm:$0xff] }
 0x284   :  { %3959 = vmatpush3.msra.mxu1 %v5239_v15  ;;  %3849 = vmatprep.subr.mxu0 %v5241_v21  ;;  %6133 = vst [vmem:[#allocation119_spill] sm:$0xff] %v5278_v34  ;;  %v556_v15 = vrot.slane %v555_v20, 2  ;;  %v1564_v21 = vand.u32 4294901760, %v1563_v38  ;;  %v5286_v27 = vand.u32 4294901760, %v934_v56  ;;  %v6141_v38 = vld [vmem:[#allocation13_spill] sm:$0xff]  ;;  %v6142_v56 = vld [vmem:[#allocation14_spill] sm:$0xff] }
 0x285   :  { %3960 = vmatprep.subr.mxu1 %v5248_v48  ;;  %3850 = vmatpush3.msra.mxu0 %v5250_v37  ;;  %6134 = vst [vmem:[#allocation120_spill] sm:$0xff] %v5282_v51  ;;  %v6137_v48 = vld [vmem:[#allocation9_spill] sm:$0xff]  ;;  %v5290_v10 = vand.u32 4294901760, %v822_v23 }
 0x286   :  { %3961 = vmatpush3.msra.mxu1 %v5257_v12  ;;  %3851 = vmatprep.subr.mxu0 %v5259_v7  ;;  %6136 = vst [vmem:[#allocation8_spill] sm:$0xff] %v5286_v27  ;;  %v6139_v7 = vld [vmem:[#allocation11_spill] sm:$0xff]  ;;  %v557_v35 = vadd.f32 %v556_v15, %v555_v20  ;;  %v6140_v12 = vld [vmem:[#allocation12_spill] sm:$0xff]  ;;  %v6144_v15 = vand.u32 4294901760, %v4984_v28  ;;  %v6150_v28 = vld [vmem:[#allocation21_spill] sm:$0xff] }
 0x287   :  { %1354 = vmatmul.mubr.f32.vlgmr.msra.gmra.mxu1 %v4975_v44  ;;  %4000 = vmatprep.subr.mxu1 %v6135_v58  ;;  %6138 = vst [vmem:[#allocation9_spill] sm:$0xff] %v5290_v10  ;;  %v6145_v20 = vld [vmem:[#allocation16_spill] sm:$0xff] }
 0x288   :  { %3852 = vmatpush3.msra.mxu0 %v5272_v3  ;;  %4001 = vmatpush3.msra.mxu1 %v6137_v48  ;;  %v558_v23 = vrot.slane %v557_v35, 1  ;;  %v6149_v3 = vld [vmem:[#allocation20_spill] sm:$0xff] }
 0x289   :  { %1565 = vmatprep.mubr.f32.mxu1 %v1564_v21  ;;  %3853 = vmatprep.subr.mxu0 %v5278_v34  ;;  %v6143_v21 = vld [vmem:[#allocation15_spill] sm:$0xff] }
 0x28a   :  { %4002 = vmatprep.subr.mxu1 %v6139_v7  ;;  %3854 = vmatpush3.msra.mxu0 %v5282_v51  ;;  %v559_v51 = vadd.f32 %v558_v23, %v557_v35  ;;  %v6148_v34 = vld [vmem:[#allocation19_spill] sm:$0xff]  ;;  %v6154_v35 = vld [vmem:[#allocation24_spill] sm:$0xff]  ;;  %v6155_v23 = vld [vmem:[#allocation25_spill] sm:$0xff] }
 0x28b   :  { %4003 = vmatpush3.msra.mxu1 %v6140_v12  ;;  %3855 = vmatprep.subr.mxu0 %v5286_v27  ;;  %v6146_v27 = vld [vmem:[#allocation17_spill] sm:$0xff] }
 0x28c   :  { %4004 = vmatprep.subr.mxu1 %v6141_v38  ;;  %3856 = vmatpush3.msra.mxu0 %v5290_v10  ;;  %v6147_v10 = vld [vmem:[#allocation18_spill] sm:$0xff]  ;;  %v5320_v37 = vand.u32 4294901760, %v559_v51 }
 0x28d   :  { %4005 = vmatpush3.msra.mxu1 %v6142_v56  ;;  %940 = vmatmul.mubr.f32.vlgmr.msra.gmra.mxu0 %v4975_v44 }
 0x28e   :  { %3895 = vmatprep.subr.mxu0 %v6135_v58  ;;  %4006 = vmatprep.subr.mxu1 %v6143_v21  ;;  %6152 = vst [vmem:[#allocation11_spill] sm:$0xff] %v5320_v37  ;;  %v5333_v29 = vsub.f32 %v559_v51, %v5320_v37  ;;  %v6162_v51 = vld [vmem:[#allocation32_spill] sm:$0xff]  ;;  %v6163_v37 = vld [vmem:[#allocation33_spill] sm:$0xff] }
 0x28f   :  { %3896 = vmatpush3.msra.mxu0 %v6137_v48  ;;  %1182 = vmatprep.mubr.f32.mxu0 %v6144_v15  ;;  %v6151_v15 = vld [vmem:[#allocation22_spill] sm:$0xff] }
 0x290   :  { %4007 = vmatpush3.msra.mxu1 %v6145_v20  ;;  %3897 = vmatprep.subr.mxu0 %v6139_v7  ;;  %v6016_v44 = vand.u32 4294901760, %v5333_v29 }
 0x291   :  { %4008 = vmatprep.subr.mxu1 %v6146_v27  ;;  %3898 = vmatpush3.msra.mxu0 %v6140_v12 }
 0x292   :  { %4009 = vmatpush3.msra.mxu1 %v6147_v10  ;;  %3899 = vmatprep.subr.mxu0 %v6141_v38  ;;  %v1569_v31 = vsub.f32 %v5333_v29, %v6016_v44  ;;  %v6171_v44 = vld [vmem:[#allocation10_spill] sm:$0xff] }
 0x293   :  { %4010 = vmatprep.subr.mxu1 %v6148_v34  ;;  %3900 = vmatpush3.msra.mxu0 %v6142_v56 }
 0x294   :  { %4011 = vmatpush3.msra.mxu1 %v6149_v3  ;;  %3901 = vmatprep.subr.mxu0 %v6143_v21  ;;  %v1570_v49 = vand.u32 4294901760, %v1569_v31  ;;  %v6202_v31 = vld [vmem:[#allocation78_spill] sm:$0xff] }
 0x295   :  { %4012 = vmatprep.subr.mxu1 %v6150_v28  ;;  %3902 = vmatpush3.msra.mxu0 %v6145_v20 }
 0x296   :  { %4013 = vmatpush3.msra.mxu1 %v6151_v15  ;;  %3903 = vmatprep.subr.mxu0 %v6146_v27 }
 0x297   :  { %4014 = vmatprep.subr.mxu1 %v6153_v30  ;;  %3904 = vmatpush3.msra.mxu0 %v6147_v10 }
 0x298   :  { %4015 = vmatpush3.msra.mxu1 %v6154_v35  ;;  %3905 = vmatprep.subr.mxu0 %v6148_v34 }
 0x299   :  { %4016 = vmatprep.subr.mxu1 %v6155_v23  ;;  %3906 = vmatpush3.msra.mxu0 %v6149_v3 }
 0x29a   :  { %4017 = vmatpush3.msra.mxu1 %v6156_v55  ;;  %3907 = vmatprep.subr.mxu0 %v6150_v28 }
 0x29b   :  { %4018 = vmatprep.subr.mxu1 %v6157_v18  ;;  %3908 = vmatpush3.msra.mxu0 %v6151_v15 }
 0x29c   :  { %4019 = vmatpush3.msra.mxu1 %v6158_v11  ;;  %3909 = vmatprep.subr.mxu0 %v6153_v30 }
 0x29d   :  { %4020 = vmatprep.subr.mxu1 %v6159_v4  ;;  %3910 = vmatpush3.msra.mxu0 %v6154_v35 }
 0x29e   :  { %4021 = vmatpush3.msra.mxu1 %v6160_v39  ;;  %3911 = vmatprep.subr.mxu0 %v6155_v23 }
 0x29f   :  { %4022 = vmatprep.subr.mxu1 %v6161_v60  ;;  %3912 = vmatpush3.msra.mxu0 %v6156_v55 }
 0x2a0   :  { %4023 = vmatpush3.msra.mxu1 %v6162_v51  ;;  %3913 = vmatprep.subr.mxu0 %v6157_v18 }
 0x2a1   :  { %4024 = vmatprep.subr.mxu1 %v6163_v37  ;;  %3914 = vmatpush3.msra.mxu0 %v6158_v11 }
 0x2a2   :  { %4025 = vmatpush3.msra.mxu1 %v6164_v26  ;;  %3915 = vmatprep.subr.mxu0 %v6159_v4 }
 0x2a3   :  { %4026 = vmatprep.subr.mxu1 %v6165_v41  ;;  %3916 = vmatpush3.msra.mxu0 %v6160_v39  ;;  %v6170_v39 = vld [vmem:[#allocation43_spill] sm:$0xff] }
 0x2a4   :  { %4027 = vmatpush3.msra.mxu1 %v6166_v63  ;;  %3917 = vmatprep.subr.mxu0 %v6161_v60 }
 0x2a5   :  { %4028 = vmatprep.subr.mxu1 %v6167_v45  ;;  %3918 = vmatpush3.msra.mxu0 %v6162_v51 }
 0x2a6   :  { %4029 = vmatpush3.msra.mxu1 %v6168_v5  ;;  %3919 = vmatprep.subr.mxu0 %v6163_v37 }
 0x2a7   :  { %4030 = vmatprep.subr.mxu1 %v6169_v47  ;;  %3920 = vmatpush3.msra.mxu0 %v6164_v26 }
 0x2a8   :  { %4031 = vmatpush3.msra.mxu1 %v6170_v39  ;;  %3921 = vmatprep.subr.mxu0 %v6165_v41 }
 0x2a9   :  { %1571 = vmatmul.mubr.f32.vlgmr.msra.gmra.mxu1 %v1570_v49  ;;  %4070 = vmatprep.subr.mxu1 %v6171_v44  ;;  %v6198_v49 = vld [vmem:[#allocation74_spill] sm:$0xff]  ;;  %v6199_v44 = vld [vmem:[#allocation77_spill] sm:$0xff] }
 0x2aa   :  { %3922 = vmatpush3.msra.mxu0 %v6166_v63  ;;  %4071 = vmatpush3.msra.mxu1 %v4615_v33  ;;  %v6172_v33 = vand.u32 4294901760, %v4978_v0  ;;  %v6200_v0 = vld [vmem:[#allocation76_spill] sm:$0xff] }
 0x2ab   :  { %1938 = vmatprep.mubr.f32.mxu1 %v5202_v57  ;;  %3923 = vmatprep.subr.mxu0 %v6167_v45 }
 0x2ac   :  { %4072 = vmatprep.subr.mxu1 %v4625_v36  ;;  %3924 = vmatpush3.msra.mxu0 %v6168_v5  ;;  %v6173_v36 = vld [vmem:[#allocation30_spill] sm:$0xff] }
 0x2ad   :  { %4073 = vmatpush3.msra.mxu1 %v4635_v40  ;;  %3925 = vmatprep.subr.mxu0 %v6169_v47  ;;  %v6174_v40 = vld [vmem:[#allocation38_spill] sm:$0xff] }
 0x2ae   :  { %4074 = vmatprep.subr.mxu1 %v4645_v43  ;;  %3926 = vmatpush3.msra.mxu0 %v6170_v39  ;;  %v6175_v43 = vld [vmem:[#allocation40_spill] sm:$0xff] }
 0x2af   :  { %4075 = vmatpush3.msra.mxu1 %v4655_v46  ;;  %1186 = vmatmul.mubr.f32.vlgmr.msra.gmra.mxu0 %v6172_v33  ;;  %v6176_v46 = vld [vmem:[#allocation42_spill] sm:$0xff]  ;;  %v6203_v33 = vld [vmem:[#allocation81_spill] sm:$0xff] }
 0x2b0   :  { %3965 = vmatprep.subr.mxu0 %v6135_v58  ;;  %4076 = vmatprep.subr.mxu1 %v4665_v50  ;;  %v6177_v50 = vld [vmem:[#allocation44_spill] sm:$0xff] }
 0x2b1   :  { %3966 = vmatpush3.msra.mxu0 %v6137_v48  ;;  %1456 = vmatprep.mubr.f32.mxu0 %v4980_v13  ;;  %v6201_v13 = vld [vmem:[#allocation79_spill] sm:$0xff] }
 0x2b2   :  { %4077 = vmatpush3.msra.mxu1 %v4672_v52  ;;  %3967 = vmatprep.subr.mxu0 %v6139_v7  ;;  %v6178_v52 = vld [vmem:[#allocation45_spill] sm:$0xff] }
 0x2b3   :  { %4078 = vmatprep.subr.mxu1 %v4680_v54  ;;  %3968 = vmatpush3.msra.mxu0 %v6140_v12  ;;  %v6179_v54 = vld [vmem:[#allocation46_spill] sm:$0xff] }
 0x2b4   :  { %4079 = vmatpush3.msra.mxu1 %v4696_v59  ;;  %3969 = vmatprep.subr.mxu0 %v6141_v38  ;;  %v6180_v59 = vld [vmem:[#allocation60_spill] sm:$0xff] }
 0x2b5   :  { %4080 = vmatprep.subr.mxu1 %v4705_v62  ;;  %3970 = vmatpush3.msra.mxu0 %v6142_v56  ;;  %v6181_v62 = vld [vmem:[#allocation96_spill] sm:$0xff] }
 0x2b6   :  { %4081 = vmatpush3.msra.mxu1 %v4715_v1  ;;  %3971 = vmatprep.subr.mxu0 %v6143_v21  ;;  %v6182_v1 = vld [vmem:[#allocation61_spill] sm:$0xff] }
 0x2b7   :  { %4082 = vmatprep.subr.mxu1 %v4725_v6  ;;  %3972 = vmatpush3.msra.mxu0 %v6145_v20  ;;  %v6183_v6 = vld [vmem:[#allocation62_spill] sm:$0xff] }
 0x2b8   :  { %4083 = vmatpush3.msra.mxu1 %v4735_v8  ;;  %3973 = vmatprep.subr.mxu0 %v6146_v27  ;;  %v6184_v8 = vld [vmem:[#allocation63_spill] sm:$0xff] }
 0x2b9   :  { %4084 = vmatprep.subr.mxu1 %v4745_v9  ;;  %3974 = vmatpush3.msra.mxu0 %v6147_v10  ;;  %v6185_v9 = vld [vmem:[#allocation64_spill] sm:$0xff] }
 0x2ba   :  { %4085 = vmatpush3.msra.mxu1 %v4755_v14  ;;  %3975 = vmatprep.subr.mxu0 %v6148_v34  ;;  %v6186_v14 = vld [vmem:[#allocation59_spill] sm:$0xff] }
 0x2bb   :  { %4086 = vmatprep.subr.mxu1 %v4765_v17  ;;  %3976 = vmatpush3.msra.mxu0 %v6149_v3  ;;  %v6187_v17 = vld [vmem:[#allocation47_spill] sm:$0xff] }
 0x2bc   :  { %4087 = vmatpush3.msra.mxu1 %v4775_v19  ;;  %3977 = vmatprep.subr.mxu0 %v6150_v28  ;;  %v6188_v19 = vld [vmem:[#allocation65_spill] sm:$0xff] }
 0x2bd   :  { %4088 = vmatprep.subr.mxu1 %v4785_v22  ;;  %3978 = vmatpush3.msra.mxu0 %v6151_v15  ;;  %v6189_v22 = vld [vmem:[#allocation66_spill] sm:$0xff] }
 0x2be   :  { %4089 = vmatpush3.msra.mxu1 %v4795_v25  ;;  %3979 = vmatprep.subr.mxu0 %v6153_v30  ;;  %v6190_v25 = vld [vmem:[#allocation67_spill] sm:$0xff] }
 0x2bf   :  { %4090 = vmatprep.subr.mxu1 %v4805_v32  ;;  %3980 = vmatpush3.msra.mxu0 %v6154_v35  ;;  %v6191_v32 = vld [vmem:[#allocation68_spill] sm:$0xff] }
 0x2c0   :  { %4091 = vmatpush3.msra.mxu1 %v4815_v42  ;;  %3981 = vmatprep.subr.mxu0 %v6155_v23  ;;  %v6192_v42 = vld [vmem:[#allocation69_spill] sm:$0xff] }
 0x2c1   :  { %4092 = vmatprep.subr.mxu1 %v4825_v53  ;;  %3982 = vmatpush3.msra.mxu0 %v6156_v55  ;;  %v6193_v53 = vld [vmem:[#allocation70_spill] sm:$0xff] }
 0x2c2   :  { %4093 = vmatpush3.msra.mxu1 %v4835_v61  ;;  %3983 = vmatprep.subr.mxu0 %v6157_v18  ;;  %v6194_v61 = vld [vmem:[#allocation71_spill] sm:$0xff] }
 0x2c3   :  { %4094 = vmatprep.subr.mxu1 %v4845_v2  ;;  %3984 = vmatpush3.msra.mxu0 %v6158_v11  ;;  %v6195_v2 = vld [vmem:[#allocation72_spill] sm:$0xff] }
 0x2c4   :  { %4095 = vmatpush3.msra.mxu1 %v4855_v16  ;;  %3985 = vmatprep.subr.mxu0 %v6159_v4  ;;  %v6196_v16 = vld [vmem:[#allocation73_spill] sm:$0xff] }
 0x2c5   :  { %4096 = vmatprep.subr.mxu1 %v4865_v24  ;;  %3986 = vmatpush3.msra.mxu0 %v6173_v36  ;;  %v6197_v24 = vld [vmem:[#allocation75_spill] sm:$0xff] }
 0x2c6   :  { %4097 = vmatpush3.msra.mxu1 %v6174_v40  ;;  %3987 = vmatprep.subr.mxu0 %v6161_v60  ;;  %v6204_v40 = vld [vmem:[#allocation80_spill] sm:$0xff] }
 0x2c7   :  { %4098 = vmatprep.subr.mxu1 %v6175_v43  ;;  %3988 = vmatpush3.msra.mxu0 %v6162_v51  ;;  %v6205_v43 = vld [vmem:[#allocation83_spill] sm:$0xff] }
 0x2c8   :  { %4099 = vmatpush3.msra.mxu1 %v6176_v46  ;;  %3989 = vmatprep.subr.mxu0 %v6163_v37  ;;  %v6206_v46 = vld [vmem:[#allocation82_spill] sm:$0xff] }
 0x2c9   :  { %4100 = vmatprep.subr.mxu1 %v6177_v50  ;;  %3990 = vmatpush3.msra.mxu0 %v6164_v26  ;;  %v6207_v50 = vld [vmem:[#allocation84_spill] sm:$0xff] }
 0x2ca   :  { %4101 = vmatpush3.msra.mxu1 %v6178_v52  ;;  %3991 = vmatprep.subr.mxu0 %v6165_v41  ;;  %v6208_v52 = vld [vmem:[#allocation85_spill] sm:$0xff] }
 0x2cb   :  { %1941 = vmatmul.mubr.f32.vlgmr.msra.gmra.mxu1 %v5333_v29  ;;  %4140 = vmatprep.subr.mxu1 %v6179_v54  ;;  %v6209_v54 = vld [vmem:[#allocation86_spill] sm:$0xff] }
 0x2cc   :  { %3992 = vmatpush3.msra.mxu0 %v6166_v63  ;;  %4141 = vmatpush3.msra.mxu1 %v6180_v59  ;;  %v6210_v59 = vld [vmem:[#allocation87_spill] sm:$0xff] }
 0x2cd   :  { %2215 = vmatprep.mubr.f32.mxu1 %v6181_v62  ;;  %3993 = vmatprep.subr.mxu0 %v6167_v45 }
 0x2ce   :  { %4142 = vmatprep.subr.mxu1 %v6182_v1  ;;  %3994 = vmatpush3.msra.mxu0 %v6168_v5  ;;  %v6211_v1 = vld [vmem:[#allocation88_spill] sm:$0xff] }
 0x2cf   :  { %4143 = vmatpush3.msra.mxu1 %v6183_v6  ;;  %3995 = vmatprep.subr.mxu0 %v6169_v47  ;;  %v6212_v6 = vld [vmem:[#allocation89_spill] sm:$0xff] }
 0x2d0   :  { %4144 = vmatprep.subr.mxu1 %v6184_v8  ;;  %3996 = vmatpush3.msra.mxu0 %v6170_v39  ;;  %v6213_v8 = vld [vmem:[#allocation90_spill] sm:$0xff] }
 0x2d1   :  { %4145 = vmatpush3.msra.mxu1 %v6185_v9  ;;  %1458 = vmatmul.mubr.f32.vlgmr.msra.gmra.mxu0 %v6186_v14  ;;  %v6214_v9 = vld [vmem:[#allocation91_spill] sm:$0xff]  ;;  %v6215_v14 = vld [vmem:[#allocation92_spill] sm:$0xff] }
 0x2d2   :  { %4035 = vmatprep.subr.mxu0 %v6187_v17  ;;  %4146 = vmatprep.subr.mxu1 %v6188_v19  ;;  %v6216_v17 = vld [vmem:[#allocation93_spill] sm:$0xff]  ;;  %v6217_v19 = vld [vmem:[#allocation94_spill] sm:$0xff] }
 0x2d3   :  { %4036 = vmatpush3.msra.mxu0 %v6189_v22  ;;  %1801 = vmatprep.mubr.f32.mxu0 %v6181_v62  ;;  %v6218_v22 = vld [vmem:[#allocation95_spill] sm:$0xff] }
 0x2d4   :  { %4147 = vmatpush3.msra.mxu1 %v6190_v25  ;;  %4037 = vmatprep.subr.mxu0 %v6191_v32  ;;  %v6219_v25 = vld [vmem:[#allocation97_spill] sm:$0xff]  ;;  %v6220_v32 = vld [vmem:[#allocation98_spill] sm:$0xff] }
 0x2d5   :  { %4148 = vmatprep.subr.mxu1 %v6192_v42  ;;  %4038 = vmatpush3.msra.mxu0 %v6193_v53  ;;  %v6221_v42 = vld [vmem:[#allocation99_spill] sm:$0xff]  ;;  %v6222_v53 = vld [vmem:[#allocation100_spill] sm:$0xff] }
 0x2d6   :  { %4149 = vmatpush3.msra.mxu1 %v6194_v61  ;;  %4039 = vmatprep.subr.mxu0 %v6195_v2  ;;  %v6223_v61 = vld [vmem:[#allocation101_spill] sm:$0xff]  ;;  %v6224_v2 = vld [vmem:[#allocation102_spill] sm:$0xff] }
 0x2d7   :  { %4150 = vmatprep.subr.mxu1 %v6196_v16  ;;  %4040 = vmatpush3.msra.mxu0 %v6197_v24  ;;  %v6225_v16 = vld [vmem:[#allocation103_spill] sm:$0xff]  ;;  %v6226_v24 = vld [vmem:[#allocation104_spill] sm:$0xff] }
 0x2d8   :  { %4151 = vmatpush3.msra.mxu1 %v6198_v49  ;;  %4041 = vmatprep.subr.mxu0 %v6199_v44  ;;  %v6227_v49 = vld [vmem:[#allocation105_spill] sm:$0xff]  ;;  %v6228_v44 = vld [vmem:[#allocation106_spill] sm:$0xff] }
 0x2d9   :  { %4152 = vmatprep.subr.mxu1 %v6200_v0  ;;  %4042 = vmatpush3.msra.mxu0 %v6201_v13  ;;  %v6229_v0 = vld [vmem:[#allocation107_spill] sm:$0xff]  ;;  %v6230_v13 = vld [vmem:[#allocation108_spill] sm:$0xff] }
 0x2da   :  { %4153 = vmatpush3.msra.mxu1 %v6202_v31  ;;  %4043 = vmatprep.subr.mxu0 %v6203_v33  ;;  %v6231_v31 = vld [vmem:[#allocation109_spill] sm:$0xff]  ;;  %v6232_v33 = vld [vmem:[#allocation110_spill] sm:$0xff] }
 0x2db   :  { %4154 = vmatprep.subr.mxu1 %v6204_v40  ;;  %4044 = vmatpush3.msra.mxu0 %v6205_v43  ;;  %v6233_v40 = vld [vmem:[#allocation111_spill] sm:$0xff]  ;;  %v6234_v43 = vld [vmem:[#allocation112_spill] sm:$0xff] }
 0x2dc   :  { %4155 = vmatpush3.msra.mxu1 %v6206_v46  ;;  %4045 = vmatprep.subr.mxu0 %v6207_v50  ;;  %v6235_v46 = vld [vmem:[#allocation113_spill] sm:$0xff]  ;;  %v6236_v50 = vld [vmem:[#allocation114_spill] sm:$0xff] }
 0x2dd   :  { %4156 = vmatprep.subr.mxu1 %v6208_v52  ;;  %4046 = vmatpush3.msra.mxu0 %v6209_v54  ;;  %v6237_v52 = vld [vmem:[#allocation115_spill] sm:$0xff]  ;;  %v6238_v54 = vld [vmem:[#allocation116_spill] sm:$0xff] }
 0x2de   :  { %4157 = vmatpush3.msra.mxu1 %v6210_v59  ;;  %4047 = vmatprep.subr.mxu0 %v6211_v1  ;;  %v6239_v59 = vld [vmem:[#allocation117_spill] sm:$0xff]  ;;  %v6240_v1 = vld [vmem:[#allocation11_spill] sm:$0xff] }
 0x2df   :  { %4158 = vmatprep.subr.mxu1 %v6212_v6  ;;  %4048 = vmatpush3.msra.mxu0 %v6213_v8  ;;  %v6241_v6 = vld [vmem:[#allocation118_spill] sm:$0xff]  ;;  %v6242_v8 = vld [vmem:[#allocation119_spill] sm:$0xff] }
 0x2e0   :  { %4159 = vmatpush3.msra.mxu1 %v6214_v9  ;;  %4049 = vmatprep.subr.mxu0 %v6215_v14  ;;  %v6243_v9 = vmov 0.0   ;;  %v6244_v14 = vld [vmem:[#allocation120_spill] sm:$0xff] }
 0x2e1   :  { %4160 = vmatprep.subr.mxu1 %v6216_v17  ;;  %4050 = vmatpush3.msra.mxu0 %v6217_v19  ;;  %v6245_v17 = vld [vmem:[#allocation8_spill] sm:$0xff]  ;;  %v6246_v19 = vld [vmem:[#allocation9_spill] sm:$0xff] }
 0x2e2   :  { %4161 = vmatpush3.msra.mxu1 %v6218_v22  ;;  %4051 = vmatprep.subr.mxu0 %v6219_v25  ;;  %v6247_v22 = vand.u32 4294901760, %v5202_v57  ;;  %v2334_v57 = vld [vmem:[#allocation4 + $0x38] sm:$0xff] }
 0x2e3   :  { %4162 = vmatprep.subr.mxu1 %v6220_v32  ;;  %4052 = vmatpush3.msra.mxu0 %v6221_v42  ;;  %v5543_v25 = vand.u32 4294901760, %v2334_v57  ;;  %v2333_v32 = vld [vmem:[#allocation4 + $0x30] sm:$0xff]  ;;  %v6248_v42 = vand.u32 4294901760, %v5333_v29 }
 0x2e4   :  { %4163 = vmatpush3.msra.mxu1 %v6222_v53  ;;  %4053 = vmatprep.subr.mxu0 %v6223_v61  ;;  %v5548_v53 = vand.u32 4294901760, %v2333_v32  ;;  %v2332_v61 = vld [vmem:[#allocation4 + $0x28] sm:$0xff] }
 0x2e5   :  { %4164 = vmatprep.subr.mxu1 %v6224_v2  ;;  %4054 = vmatpush3.msra.mxu0 %v6225_v16  ;;  %v5553_v2 = vsub.f32 %v2334_v57, %v5543_v25  ;;  %v5555_v16 = vand.u32 4294901760, %v2332_v61 }
 0x2e6   :  { %4165 = vmatpush3.msra.mxu1 %v6226_v24  ;;  %4055 = vmatprep.subr.mxu0 %v6227_v49  ;;  %v2331_v24 = vld [vmem:[#allocation4 + $0x20] sm:$0xff]  ;;  %v5559_v29 = vsub.f32 %v2333_v32, %v5548_v53 }
 0x2e7   :  { %4166 = vmatprep.subr.mxu1 %v6228_v44  ;;  %4056 = vmatpush3.msra.mxu0 %v6229_v0  ;;  %v5561_v49 = vand.u32 4294901760, %v2331_v24  ;;  %v2329_v0 = vld [vmem:[#allocation4 + $0x10] sm:$0xff] }
 0x2e8   :  { %4167 = vmatpush3.msra.mxu1 %v6230_v13  ;;  %4057 = vmatprep.subr.mxu0 %v6231_v31  ;;  %v5579_v31 = vand.u32 4294901760, %v2329_v0 }
 0x2e9   :  { %4168 = vmatprep.subr.mxu1 %v6232_v33  ;;  %4058 = vmatpush3.msra.mxu0 %v6233_v40  ;;  %v5577_v13 = vsub.f32 %v2331_v24, %v5561_v49 }
 0x2ea   :  { %4169 = vmatpush3.msra.mxu1 %v6234_v43  ;;  %4059 = vmatprep.subr.mxu0 %v6235_v46  ;;  %v2327_v43 = vld [vmem:[#allocation4] sm:$0xff] }
 0x2eb   :  { %4170 = vmatprep.subr.mxu1 %v6236_v50  ;;  %4060 = vmatpush3.msra.mxu0 %v6237_v52  ;;  %v5594_v46 = vand.u32 4294901760, %v5577_v13  ;;  %v5599_v50 = vand.u32 4294901760, %v2327_v43 }
 0x2ec   :  { %4171 = vmatpush3.msra.mxu1 %v6238_v54  ;;  %4061 = vmatprep.subr.mxu0 %v6239_v59 }
 0x2ed   :  { %2217 = vmatmul.mubr.f32.vlgmr.msra.gmra.mxu1 %v6240_v1  ;;  %4062 = vmatpush3.msra.mxu0 %v6241_v6  ;;  %v5615_v59 = vsub.f32 %v2327_v43, %v5599_v50 }
 0x2ee   :  { %4063 = vmatprep.subr.mxu0 %v6242_v8  ;;  %2793 = vmatprep.mubr.f32.mxu1 %v6243_v9 }
 0x2ef   :  { %4064 = vmatpush3.msra.mxu0 %v6244_v14 }
 0x2f0   :  { %4065 = vmatprep.subr.mxu0 %v6245_v17 }
 0x2f1   :  { %4066 = vmatpush3.msra.mxu0 %v6246_v19 }
 0x2f2   :  { %1803 = vmatmul.mubr.f32.vlgmr.msra.gmra.mxu0 %v6240_v1  ;;  %4105 = vmatprep.subr.mxu0 %v6135_v58 }
 0x2f3   :  { %4106 = vmatpush3.msra.mxu0 %v6137_v48  ;;  %2045 = vmatprep.mubr.f32.mxu0 %v6247_v22 }
 0x2f4   :  { %4107 = vmatprep.subr.mxu0 %v6139_v7 }
 0x2f5   :  { %4108 = vmatpush3.msra.mxu0 %v6140_v12 }
 0x2f6   :  { %4109 = vmatprep.subr.mxu0 %v6141_v38 }
 0x2f7   :  { %4110 = vmatpush3.msra.mxu0 %v6142_v56 }
 0x2f8   :  { %4111 = vmatprep.subr.mxu0 %v6143_v21 }
 0x2f9   :  { %4112 = vmatpush3.msra.mxu0 %v6145_v20 }
 0x2fa   :  { %4113 = vmatprep.subr.mxu0 %v6146_v27 }
 0x2fb   :  { %4114 = vmatpush3.msra.mxu0 %v6147_v10 }
 0x2fc   :  { %4115 = vmatprep.subr.mxu0 %v6148_v34 }
 0x2fd   :  { %4116 = vmatpush3.msra.mxu0 %v6149_v3 }
 0x2fe   :  { %4117 = vmatprep.subr.mxu0 %v6150_v28 }
 0x2ff   :  { %4118 = vmatpush3.msra.mxu0 %v6151_v15 }
 0x300   :  { %4119 = vmatprep.subr.mxu0 %v6153_v30 }
 0x301   :  { %4120 = vmatpush3.msra.mxu0 %v6154_v35 }
 0x302   :  { %4121 = vmatprep.subr.mxu0 %v6155_v23 }
 0x303   :  { %4122 = vmatpush3.msra.mxu0 %v6156_v55 }
 0x304   :  { %4123 = vmatprep.subr.mxu0 %v6157_v18 }
 0x305   :  { %4124 = vmatpush3.msra.mxu0 %v6158_v11 }
 0x306   :  { %4125 = vmatprep.subr.mxu0 %v6159_v4 }
 0x307   :  { %4126 = vmatpush3.msra.mxu0 %v6173_v36 }
 0x308   :  { %4127 = vmatprep.subr.mxu0 %v6161_v60 }
 0x309   :  { %4128 = vmatpush3.msra.mxu0 %v6162_v51 }
 0x30a   :  { %4129 = vmatprep.subr.mxu0 %v6163_v37 }
 0x30b   :  { %4130 = vmatpush3.msra.mxu0 %v6164_v26 }
 0x30c   :  { %4131 = vmatprep.subr.mxu0 %v6165_v41 }
 0x30d   :  { %4132 = vmatpush3.msra.mxu0 %v6166_v63 }
 0x30e   :  { %4133 = vmatprep.subr.mxu0 %v6167_v45 }
 0x30f   :  { %4134 = vmatpush3.msra.mxu0 %v6168_v5 }
 0x310   :  { %4135 = vmatprep.subr.mxu0 %v6169_v47 }
 0x311   :  { %4136 = vmatpush3.msra.mxu0 %v6170_v39 }
 0x312   :  { %2049 = vmatmul.mubr.f32.vlgmr.msra.gmra.mxu0 %v6248_v42  ;;  %4175 = vmatprep.subr.mxu0 %v6135_v58  ;;  %v2330_v58 = vld [vmem:[#allocation4 + $0x18] sm:$0xff]  ;;  %v2467_v42 = vsub.f32 %v5577_v13, %v5594_v46 }
 0x313   :  { %4176 = vmatpush3.msra.mxu0 %v6137_v48  ;;  %2319 = vmatprep.mubr.f32.mxu0 %v6181_v62  ;;  %v5565_v48 = vand.u32 4294901760, %v5553_v2  ;;  %v5568_v62 = vsub.f32 %v2332_v61, %v5555_v16  ;;  %v5570_v44 = vand.u32 4294901760, %v2330_v58 }
 0x314   :  { %4177 = vmatprep.subr.mxu0 %v6139_v7  ;;  %v5574_v7 = vand.u32 4294901760, %v5559_v29 }
 0x315   :  { %4178 = vmatpush3.msra.mxu0 %v6140_v12  ;;  %v2328_v12 = vld [vmem:[#allocation4 + $0x8] sm:$0xff]  ;;  %2732 = vmatprep.subr.mxu1 %v5565_v48  ;;  %v5584_v33 = vand.u32 4294901760, %v5568_v62  ;;  %v5587_v40 = vsub.f32 %v2330_v58, %v5570_v44 }
 0x316   :  { %4179 = vmatprep.subr.mxu0 %v6141_v38  ;;  %v5589_v38 = vand.u32 4294901760, %v2328_v12  ;;  %2736 = vmatpush1.msra.mxu1 %v5574_v7  ;;  %v2455_v22 = vsub.f32 %v5559_v29, %v5574_v7 }
 0x317   :  { %4180 = vmatpush3.msra.mxu0 %v6142_v56  ;;  %v5597_v56 = vsub.f32 %v2329_v0, %v5579_v31  ;;  %2740 = vmatprep.subr.mxu1 %v5584_v33  ;;  %v5604_v52 = vand.u32 4294901760, %v5587_v40  ;;  %v2461_v32 = vsub.f32 %v5568_v62, %v5584_v33 }
 0x318   :  { %4181 = vmatprep.subr.mxu0 %v6143_v21  ;;  %v5607_v54 = vsub.f32 %v2328_v12, %v5589_v38  ;;  %2744 = vmatpush1.msra.mxu1 %v5594_v46  ;;  %v2456_v58 = vand.u32 4294901760, %v2455_v22 }
 0x319   :  { %4182 = vmatpush3.msra.mxu0 %v6145_v20  ;;  %v5612_v21 = vand.u32 4294901760, %v5597_v56  ;;  %2748 = vmatprep.subr.mxu1 %v5604_v52  ;;  %v2473_v24 = vsub.f32 %v5587_v40, %v5604_v52  ;;  %v2462_v43 = vand.u32 4294901760, %v2461_v32 }
 0x31a   :  { %4183 = vmatprep.subr.mxu0 %v6146_v27  ;;  %v5620_v20 = vand.u32 4294901760, %v5607_v54  ;;  %v5625_v27 = vand.u32 4294901760, %v5615_v59 }
 0x31b   :  { %4184 = vmatpush3.msra.mxu0 %v6147_v10  ;;  %2752 = vmatpush1.msra.mxu1 %v5612_v21  ;;  %v2479_v0 = vsub.f32 %v5597_v56, %v5612_v21 }
 0x31c   :  { %4185 = vmatprep.subr.mxu0 %v6148_v34  ;;  %2756 = vmatprep.subr.mxu1 %v5620_v20 }
 0x31d   :  { %4186 = vmatpush3.msra.mxu0 %v6149_v3  ;;  %2760 = vmatpush1.msra.mxu1 %v5625_v27 }
 0x31e   :  { %4187 = vmatprep.subr.mxu0 %v6150_v28  ;;  %2909 = vmatprep.subr.mxu1 %v5543_v25 }
 0x31f   :  { %4188 = vmatpush3.msra.mxu0 %v6151_v15 }
 0x320   :  { %4189 = vmatprep.subr.mxu0 %v6153_v30 }
 0x321   :  { %4190 = vmatpush3.msra.mxu0 %v6154_v35 }
 0x322   :  { %4191 = vmatprep.subr.mxu0 %v6155_v23 }
 0x323   :  { %4192 = vmatpush3.msra.mxu0 %v6156_v55 }
 0x324   :  { %4193 = vmatprep.subr.mxu0 %v6157_v18 }
 0x325   :  { %4194 = vmatpush3.msra.mxu0 %v6158_v11  ;;  %v2449_v11 = vsub.f32 %v5553_v2, %v5565_v48 }
 0x326   :  { %4195 = vmatprep.subr.mxu0 %v6159_v4  ;;  %v3892_v18 = vpop.f32.mrf.mxu1 }
 0x327   :  { %4196 = vmatpush3.msra.mxu0 %v6173_v36 }
 0x328   :  { %4197 = vmatprep.subr.mxu0 %v6161_v60  ;;  %v3893_v30 = vpop.f32.mrf.mxu1 }
 0x329   :  { %4198 = vmatpush3.msra.mxu0 %v6162_v51  ;;  %v3894_v3 = vadd.f32 %v3893_v30, %v3892_v18 }
 0x32a   :  { %4199 = vmatprep.subr.mxu0 %v6163_v37 }
 0x32b   :  { %4200 = vmatpush3.msra.mxu0 %v6164_v26 }
 0x32c   :  { %4201 = vmatprep.subr.mxu0 %v6165_v41  ;;  %v3822_v26 = vpop.f32.mrf.mxu0 }
 0x32d   :  { %4202 = vmatpush3.msra.mxu0 %v6166_v63 }
 0x32e   :  { %4203 = vmatprep.subr.mxu0 %v6167_v45  ;;  %v3823_v41 = vpop.f32.mrf.mxu0 }
 0x32f   :  { %4204 = vmatpush3.msra.mxu0 %v6168_v5  ;;  %v3824_v55 = vadd.f32 %v3823_v41, %v3822_v26  ;;  %v2468_v26 = vand.u32 4294901760, %v2467_v42  ;;  %v2491_v41 = vsub.f32 %v5615_v59, %v5625_v27 }
 0x330   :  { %4205 = vmatprep.subr.mxu0 %v6169_v47  ;;  %v5660_v47 = vand.u32 4294901760, %v2449_v11  ;;  %v2485_v11 = vsub.f32 %v5607_v54, %v5620_v20 }
 0x331   :  { %4206 = vmatpush3.msra.mxu0 %v6170_v39 }
 0x332   :  { %2321 = vmatmul.mubr.f32.vlgmr.msra.gmra.mxu0 %v6240_v1  ;;  %2363 = vmatprep.subr.mxu0 %v5543_v25  ;;  %v2486_v18 = vand.u32 4294901760, %v2485_v11 }
 0x333   :  { %2365 = vmatpush1.msra.mxu0 %v5548_v53  ;;  %2410 = vmatprep.mubr.f32.mxu0 %v6243_v9 }
 0x334   :  { %2367 = vmatprep.subr.mxu0 %v5555_v16 }
 0x335   :  { %2369 = vmatpush1.msra.mxu0 %v5561_v49 }
 0x336   :  { %2371 = vmatprep.subr.mxu0 %v5570_v44 }
 0x337   :  { %2373 = vmatpush1.msra.mxu0 %v5579_v31 }
 0x338   :  { %2375 = vmatprep.subr.mxu0 %v5589_v38 }
 0x339   :  { %2377 = vmatpush1.msra.mxu0 %v5599_v50 }
 0x33a   :  { %2451 = vmatprep.subr.mxu0 %v5660_v47 }
 0x347   :  { %v3962_v63 = vpop.f32.mrf.mxu1 }
 0x349   :  { %v3963_v28 = vpop.f32.mrf.mxu1 }
 0x34a   :  { %v3964_v23 = vadd.f32 %v3963_v28, %v3962_v63 }
 0x34d   :  { %v3857_v4 = vpop.f32.mrf.mxu0 }
 0x34f   :  { %v3858_v39 = vpop.f32.mrf.mxu0 }
 0x350   :  { %v3859_v37 = vadd.f32 %v3858_v39, %v3857_v4  ;;  %v2474_v4 = vand.u32 4294901760, %v2473_v24  ;;  %v2480_v39 = vand.u32 4294901760, %v2479_v0 }
 0x352   :  { %v942_v45 = vadd.f32 %v3859_v37, %v3824_v55 }
 0x354   :  { %v1080_v10 = vadd.f32 %v3894_v3, %v942_v45 }
 0x36f   :  { %v3927_v60 = vpop.f32.mrf.mxu0 }
 0x371   :  { %v3928_v5 = vpop.f32.mrf.mxu0 }
 0x372   :  { %v3929_v34 = vadd.f32 %v3928_v5, %v3927_v60  ;;  %v2492_v60 = vand.u32 4294901760, %v2491_v41 }
 0x374   :  { %v1188_v15 = vadd.f32 %v3929_v34, %v1080_v10 }
 0x376   :  { %v1356_v36 = vadd.f32 %v3964_v23, %v1188_v15 }
 0x391   :  { %v3997_v35 = vpop.f32.mrf.mxu0 }
 0x393   :  { %v3998_v51 = vpop.f32.mrf.mxu0 }
 0x394   :  { %v3999_v1 = vadd.f32 %v3998_v51, %v3997_v35 }
 0x396   :  { %v1460_v6 = vadd.f32 %v3999_v1, %v1356_v36 }
 0x398   :  { %v1463_v8 = vmul.f32 0.004464286, %v1460_v6 }
 0x39a   :  { %v2336_v14 = vsel %vm157_vm13, %v1463_v8, 0 }
 0x39b   :  { %v5667_v17 = vand.u32 4294901760, %v2336_v14 }
 0x39d   :  { %v2412_v19 = vsub.f32 %v2336_v14, %v5667_v17  ;;  %2795 = vmatmul.mubr.f32.vlgmr.msra.gmra.mxu1 %v5667_v17 }
 0x39e   :  { %2911 = vmatpush1.msra.mxu1 %v5548_v53  ;;  %2956 = vmatprep.mubr.f32.mxu1 %v6243_v9 }
 0x39f   :  { %v2413_v57 = vand.u32 4294901760, %v2412_v19  ;;  %2913 = vmatprep.subr.mxu1 %v5555_v16 }
 0x3a0   :  { %2915 = vmatpush1.msra.mxu1 %v5561_v49 }
 0x3a1   :  { %v2414_v61 = vsub.f32 %v2412_v19, %v2413_v57  ;;  %2917 = vmatprep.subr.mxu1 %v5570_v44 }
 0x3a2   :  { %2919 = vmatpush1.msra.mxu1 %v5579_v31 }
 0x3a3   :  { %v2415_v12 = vand.u32 4294901760, %v2414_v61  ;;  %2921 = vmatprep.subr.mxu1 %v5589_v38 }
 0x3a4   :  { %2923 = vmatpush1.msra.mxu1 %v5599_v50 }
 0x3a5   :  { %2416 = vmatmul.mubr.f32.vlgmr.msra.gmra.mxu0 %v2415_v12  ;;  %3106 = vmatprep.subr.mxu1 %v5553_v2 }
 0x3a6   :  { %2457 = vmatpush1.msra.mxu0 %v2456_v58  ;;  %2526 = vmatprep.mubr.f32.mxu0 %v6243_v9 }
 0x3a7   :  { %2463 = vmatprep.subr.mxu0 %v2462_v43 }
 0x3a8   :  { %2469 = vmatpush1.msra.mxu0 %v2468_v26 }
 0x3a9   :  { %2475 = vmatprep.subr.mxu0 %v2474_v4 }
 0x3aa   :  { %2481 = vmatpush1.msra.mxu0 %v2480_v39 }
 0x3ab   :  { %2487 = vmatprep.subr.mxu0 %v2486_v18 }
 0x3ac   :  { %2493 = vmatpush1.msra.mxu0 %v2492_v60 }
 0x3ad   :  { %2528 = vmatmul.mubr.f32.vlgmr.msra.gmra.mxu0 %v5667_v17  ;;  %2560 = vmatprep.subr.mxu0 %v5553_v2  ;;  %v4032_v2 = vpop.f32.mrf.mxu1 }
 0x3ae   :  { %2563 = vmatpush1.msra.mxu0 %v5559_v29  ;;  %2614 = vmatprep.mubr.f32.mxu0 %v6243_v9 }
 0x3af   :  { %2566 = vmatprep.subr.mxu0 %v5568_v62  ;;  %v4033_v55 = vpop.f32.mrf.mxu1 }
 0x3b0   :  { %2569 = vmatpush1.msra.mxu0 %v5577_v13  ;;  %v4034_v3 = vadd.f32 %v4033_v55, %v4032_v2 }
 0x3b1   :  { %2572 = vmatprep.subr.mxu0 %v5587_v40  ;;  %v4102_v5 = vpop.f32.mrf.mxu1 }
 0x3b2   :  { %2575 = vmatpush1.msra.mxu0 %v5597_v56  ;;  %v4067_v37 = vpop.f32.mrf.mxu0 }
 0x3b3   :  { %2578 = vmatprep.subr.mxu0 %v5607_v54 }
 0x3b4   :  { %2581 = vmatpush1.msra.mxu0 %v5615_v59  ;;  %v4068_v30 = vpop.f32.mrf.mxu0 }
 0x3b5   :  { %2617 = vmatmul.mubr.f32.vlgmr.msra.gmra.mxu0 %v2412_v19  ;;  %2648 = vmatprep.subr.mxu0 %v5543_v25  ;;  %v4069_v63 = vadd.f32 %v4068_v30, %v4067_v37 }
 0x3b6   :  { %2650 = vmatpush1.msra.mxu0 %v5548_v53  ;;  %2695 = vmatprep.mubr.f32.mxu0 %v6243_v9 }
 0x3b7   :  { %2652 = vmatprep.subr.mxu0 %v5555_v16  ;;  %v1805_v10 = vadd.f32 %v4069_v63, %v4034_v3 }
 0x3b8   :  { %2654 = vmatpush1.msra.mxu0 %v5561_v49 }
 0x3b9   :  { %2656 = vmatprep.subr.mxu0 %v5570_v44 }
 0x3ba   :  { %2658 = vmatpush1.msra.mxu0 %v5579_v31 }
 0x3bb   :  { %2660 = vmatprep.subr.mxu0 %v5589_v38 }
 0x3bc   :  { %2662 = vmatpush1.msra.mxu0 %v5599_v50 }
 0x3bd   :  { %2699 = vmatmul.mubr.f32.vlgmr.msra.gmra.mxu0 %v2413_v57  ;;  %2826 = vmatprep.subr.mxu0 %v5543_v25 }
 0x3be   :  { %2828 = vmatpush1.msra.mxu0 %v5548_v53  ;;  %2873 = vmatprep.mubr.f32.mxu0 %v6243_v9 }
 0x3bf   :  { %2830 = vmatprep.subr.mxu0 %v5555_v16 }
 0x3c0   :  { %2832 = vmatpush1.msra.mxu0 %v5561_v49 }
 0x3c1   :  { %2834 = vmatprep.subr.mxu0 %v5570_v44 }
 0x3c2   :  { %2836 = vmatpush1.msra.mxu0 %v5579_v31 }
 0x3c3   :  { %2838 = vmatprep.subr.mxu0 %v5589_v38 }
 0x3c4   :  { %2840 = vmatpush1.msra.mxu0 %v5599_v50 }
 0x3c5   :  { %2875 = vmatmul.mubr.f32.vlgmr.msra.gmra.mxu0 %v5667_v17  ;;  %2997 = vmatprep.subr.mxu0 %v5660_v47  ;;  %v4103_v47 = vpop.f32.mrf.mxu1 }
 0x3c6   :  { %3003 = vmatpush1.msra.mxu0 %v2456_v58  ;;  %3072 = vmatprep.mubr.f32.mxu0 %v6243_v9  ;;  %v4104_v15 = vadd.f32 %v4103_v47, %v4102_v5 }
 0x3c7   :  { %3009 = vmatprep.subr.mxu0 %v2462_v43  ;;  %v4172_v28 = vpop.f32.mrf.mxu1 }
 0x3c8   :  { %3015 = vmatpush1.msra.mxu0 %v2468_v26  ;;  %v1943_v23 = vadd.f32 %v4104_v15, %v1805_v10 }
 0x3c9   :  { %3021 = vmatprep.subr.mxu0 %v2474_v4  ;;  %v4173_v51 = vpop.f32.mrf.mxu1 }
 0x3ca   :  { %3027 = vmatpush1.msra.mxu0 %v2480_v39  ;;  %v4174_v6 = vadd.f32 %v4173_v51, %v4172_v28 }
 0x3cb   :  { %3033 = vmatprep.subr.mxu0 %v2486_v18 }
 0x3cc   :  { %3039 = vmatpush1.msra.mxu0 %v2492_v60 }
 0x3cd   :  { %3194 = vmatprep.subr.mxu0 %v5543_v25 }
 0x3d2   :  { %v4137_v45 = vpop.f32.mrf.mxu0 }
 0x3d4   :  { %v4138_v34 = vpop.f32.mrf.mxu0 }
 0x3d5   :  { %v4139_v35 = vadd.f32 %v4138_v34, %v4137_v45 }
 0x3d7   :  { %v2051_v36 = vadd.f32 %v4139_v35, %v1943_v23 }
 0x3d9   :  { %v2219_v14 = vadd.f32 %v4174_v6, %v2051_v36 }
 0x3f2   :  { %v4207_v1 = vpop.f32.mrf.mxu0 }
 0x3f4   :  { %v4208_v8 = vpop.f32.mrf.mxu0 }
 0x3f5   :  { %v4209_v17 = vadd.f32 %v4208_v8, %v4207_v1 }
 0x3f7   :  { %v2323_v19 = vadd.f32 %v4209_v17, %v2219_v14 }
 0x3f9   :  { %v2326_v22 = vmul.f32 0.004464286, %v2323_v19 }
 0x3fb   :  { %v2882_v57 = vsel %vm157_vm13, %v2326_v22, 0 }
 0x3fc   :  { %v2957_v32 = vand.u32 4294901760, %v2882_v57 }
 0x3fe   :  { %v2958_v42 = vsub.f32 %v2882_v57, %v2957_v32  ;;  %3074 = vmatmul.mubr.f32.vlgmr.msra.gmra.mxu0 %v2957_v32 }
 0x3ff   :  { %3196 = vmatpush1.msra.mxu0 %v5548_v53  ;;  %3241 = vmatprep.mubr.f32.mxu0 %v6243_v9 }
 0x400   :  { %3198 = vmatprep.subr.mxu0 %v5555_v16  ;;  %v2959_v61 = vand.u32 4294901760, %v2958_v42 }
 0x401   :  { %3200 = vmatpush1.msra.mxu0 %v5561_v49 }
 0x402   :  { %3202 = vmatprep.subr.mxu0 %v5570_v44  ;;  %v2960_v24 = vsub.f32 %v2958_v42, %v2959_v61 }
 0x403   :  { %3204 = vmatpush1.msra.mxu0 %v5579_v31 }
 0x404   :  { %3206 = vmatprep.subr.mxu0 %v5589_v38  ;;  %v2961_v58 = vand.u32 4294901760, %v2960_v24 }
 0x405   :  { %3208 = vmatpush1.msra.mxu0 %v5599_v50 }
 0x406   :  { %3245 = vmatmul.mubr.f32.vlgmr.msra.gmra.mxu0 %v2959_v61  ;;  %3372 = vmatprep.subr.mxu0 %v5543_v25  ;;  %v4319_v25 = vld [vmem:[%s5847_s3 + $0x78] sm:$0xff]  }
 0x407   :  { %2962 = vmatmul.mubr.f32.vlgmr.msra.gmra.mxu1 %v2961_v58  ;;  %3374 = vmatpush1.msra.mxu0 %v5548_v53  ;;  %v4321_v53 = vld [vmem:[%s5847_s3 + $0x70] sm:$0xff]  }
 0x408   :  { %3109 = vmatpush1.msra.mxu1 %v5559_v29  ;;  %3376 = vmatprep.subr.mxu0 %v5555_v16  ;;  %v4322_v16 = vld [vmem:[%s5847_s3 + $0x30] sm:$0xff]   ;;  %v4323_v29 = vld [vmem:[%s5847_s3 + $0x68] sm:$0xff]  }
 0x409   :  { %3112 = vmatprep.subr.mxu1 %v5568_v62  ;;  %3378 = vmatpush1.msra.mxu0 %v5561_v49  ;;  %v4324_v49 = vld [vmem:[%s5847_s3 + $0x28] sm:$0xff]   ;;  %v4326_v62 = vld [vmem:[%s5847_s3 + $0x20] sm:$0xff]  }
 0x40a   :  { %3115 = vmatpush1.msra.mxu1 %v5577_v13  ;;  %3380 = vmatprep.subr.mxu0 %v5570_v44  ;;  %v4327_v44 = vld [vmem:[%s5847_s3 + $0x58] sm:$0xff]   ;;  %v4329_v13 = vld [vmem:[%s5847_s3 + $0x50] sm:$0xff]  }
 0x40b   :  { %3118 = vmatprep.subr.mxu1 %v5587_v40  ;;  %3382 = vmatpush1.msra.mxu0 %v5579_v31  ;;  %v4330_v31 = vld [vmem:[%s5847_s3 + $0x10] sm:$0xff]   ;;  %v4332_v40 = vld [vmem:[%s5847_s3 + $0x8] sm:$0xff]  }
 0x40c   :  { %3121 = vmatpush1.msra.mxu1 %v5597_v56  ;;  %3384 = vmatprep.subr.mxu0 %v5589_v38  ;;  %v4333_v38 = vld [vmem:[%s5847_s3 + $0x40] sm:$0xff]  }
 0x40d   :  { %3124 = vmatprep.subr.mxu1 %v5607_v54  ;;  %3160 = vmatprep.mubr.f32.mxu1 %v6243_v9 }
 0x40e   :  { %3127 = vmatpush1.msra.mxu1 %v5615_v59  ;;  %3386 = vmatpush1.msra.mxu0 %v5599_v50 }
 0x40f   :  { %3419 = vmatprep.mubr.f32.mxu0 %v6243_v9  ;;  %3163 = vmatmul.mubr.f32.vlgmr.msra.gmra.mxu1 %v2958_v42 }
 0x410   :  { %3278 = vmatprep.subr.mxu1 %v5565_v48  ;;  %3421 = vmatmul.mubr.f32.vlgmr.msra.gmra.mxu0 %v2957_v32  ;;  %v4325_v48 = vld [vmem:[%s5847_s3 + $0x60] sm:$0xff]  }
 0x411   :  { %3282 = vmatpush1.msra.mxu1 %v5574_v7  ;;  %3339 = vmatprep.mubr.f32.mxu1 %v6243_v9  ;;  %v4320_v9 = vld [vmem:[%s5847_s3 + $0x38] sm:$0xff]  }
 0x412   :  { %3286 = vmatprep.subr.mxu1 %v5584_v33  ;;  %v4328_v7 = vld [vmem:[%s5847_s3 + $0x18] sm:$0xff]   ;;  %v4331_v33 = vld [vmem:[%s5847_s3 + $0x48] sm:$0xff]  }
 0x413   :  { %3290 = vmatpush1.msra.mxu1 %v5594_v46  ;;  %v4334_v46 = vld [vmem:[%s5847_s3] sm:$0xff]  }
 0x414   :  { %3294 = vmatprep.subr.mxu1 %v5604_v52 }
 0x415   :  { %3298 = vmatpush1.msra.mxu1 %v5612_v21 }
 0x416   :  { %3302 = vmatprep.subr.mxu1 %v5620_v20 }
 0x417   :  { %3306 = vmatpush1.msra.mxu1 %v5625_v27 }
 0x418   :  { %3341 = vmatmul.mubr.f32.vlgmr.msra.gmra.mxu1 %v2957_v32  ;;  %4210 = vmatprep.subr.bf16.mxu1 %v4319_v25 }
 0x419   :  { %4211 = vmatpush3.bf16.msra.mxu1 %v4320_v9 }
 0x41a   :  { %4212 = vmatprep.subr.bf16.mxu1 %v4321_v53  ;;  %v4393_v53 = vmov 1966171168  }
 0x41d   :  { %4213 = vmatpush3.bf16.msra.mxu1 %v4322_v16  ;;  %v3441_v16 = vunpack.c.l.s4 %v4393_v53 }
 0x41e   :  { %4214 = vmatprep.subr.bf16.mxu1 %v4323_v29 }
 0x41f   :  { %v3442_v29 = vunpack.c.0.s8 %v3441_v16 }
 0x421   :  { %4215 = vmatpush3.bf16.msra.mxu1 %v4324_v49 }
 0x422   :  { %4216 = vmatprep.subr.bf16.mxu1 %v4325_v48  ;;  %v6249_v48 = vld [vmem:[#allocation48_spill] sm:$0xff] }
 0x425   :  { %4217 = vmatpush3.bf16.msra.mxu1 %v4326_v62  ;;  %v3445_v62 = vsub.s32 %v3442_v29, %v6249_v48 }
 0x426   :  { %4218 = vmatprep.subr.bf16.mxu1 %v4327_v44 }
 0x429   :  { %4219 = vmatpush3.bf16.msra.mxu1 %v4328_v7 }
 0x42a   :  { %4220 = vmatprep.subr.bf16.mxu1 %v4329_v13 }
 0x42d   :  { %4221 = vmatpush3.bf16.msra.mxu1 %v4330_v31  ;;  %v3771_v31 = vld [vmem:[%s5848_s4 + $0x1] ss:$4 sm:$0x3] }
 0x42e   :  { %4222 = vmatprep.subr.bf16.mxu1 %v4331_v33 }
 0x431   :  { %4223 = vmatpush3.bf16.msra.mxu1 %v4332_v40 }
 0x432   :  { %4224 = vmatprep.subr.bf16.mxu1 %v4333_v38  ;;  %v6250_v38 = vld [vmem:[#allocation49_spill] sm:$0xff] }
 0x435   :  { %4225 = vmatpush3.bf16.msra.mxu1 %v4334_v46 }
 0x45d   :  { %v2796_v27 = vpop.f32.mrf.mxu1 }
 0x45f   :  { %v2798_v43 = vpop.f32.mrf.mxu1 }
 0x465   :  { %v2417_v56 = vpop.f32.mrf.mxu0 }
 0x467   :  { %v2419_v50 = vpop.f32.mrf.mxu0 }
 0x46d   :  { %v2529_v52 = vpop.f32.mrf.mxu0 }
 0x46e   :  { %v2530_v4 = vadd.f32 %v2529_v52, %v2417_v56  ;;  %v6251_v56 = vld [vmem:[#allocation50_spill] sm:$0xff] }
 0x46f   :  { %v2531_v54 = vpop.f32.mrf.mxu0 }
 0x470   :  { %v2532_v18 = vadd.f32 %v2531_v54, %v2419_v50 }
 0x475   :  { %v2618_v21 = vpop.f32.mrf.mxu0 }
 0x476   :  { %v2619_v60 = vadd.f32 %v2618_v21, %v2530_v4  ;;  %v6254_v4 = vld [vmem:[#allocation52_spill] sm:$0xff] }
 0x477   :  { %v2620_v59 = vpop.f32.mrf.mxu0 }
 0x478   :  { %v2621_v55 = vadd.f32 %v2620_v59, %v2532_v18  ;;  %v6255_v18 = vld [vmem:[#allocation51_spill] sm:$0xff] }
 0x47d   :  { %v2700_v20 = vpop.f32.mrf.mxu0 }
 0x47e   :  { %v2701_v30 = vadd.f32 %v2700_v20, %v2619_v60  ;;  %v3772_v20 = vld [vmem:[%s5848_s4 + $0x2] ss:$4 sm:$0x3] }
 0x47f   :  { %v2702_v0 = vpop.f32.mrf.mxu0 }
 0x480   :  { %v2703_v3 = vadd.f32 %v2702_v0, %v2621_v55  ;;  %v2797_v10 = vadd.f32 %v2796_v27, %v2701_v30  ;;  %v6257_v30 = vld [vmem:[#allocation58_spill] sm:$0xff] }
 0x482   :  { %v2799_v23 = vadd.f32 %v2798_v43, %v2703_v3 }
 0x485   :  { %v2876_v12 = vpop.f32.mrf.mxu0 }
 0x486   :  { %v2877_v35 = vadd.f32 %v2876_v12, %v2797_v10  ;;  %v6252_v12 = vld [vmem:[#allocation55_spill] sm:$0xff] }
 0x487   :  { %v2878_v26 = vpop.f32.mrf.mxu0 }
 0x488   :  { %v2879_v6 = vadd.f32 %v2878_v26, %v2799_v23  ;;  %v3427_v19 = vmul.f32 %v2877_v35, %v2877_v35 }
 0x48a   :  { %v3428_v42 = vmul.f32 %v2879_v6, %v2879_v6 }
 0x4be   :  { %v3075_v41 = vpop.f32.mrf.mxu0 }
 0x4c0   :  { %v3077_v37 = vpop.f32.mrf.mxu0 }
 0x4c6   :  { %v3246_v45 = vpop.f32.mrf.mxu0 }
 0x4c7   :  { %v2963_v11 = vpop.f32.mrf.mxu1 }
 0x4c8   :  { %v3076_v5 = vadd.f32 %v3075_v41, %v2963_v11  ;;  %v3248_v15 = vpop.f32.mrf.mxu0  ;;  %v6253_v11 = vld [vmem:[#allocation53_spill] sm:$0xff] }
 0x4c9   :  { %v2965_v39 = vpop.f32.mrf.mxu1 }
 0x4ca   :  { %v3078_v47 = vadd.f32 %v3077_v37, %v2965_v39  ;;  %v6256_v37 = vld [vmem:[#allocation56_spill] sm:$0xff] }
 0x4cf   :  { %v3164_v2 = vpop.f32.mrf.mxu1 }
 0x4d0   :  { %v3165_v34 = vadd.f32 %v3164_v2, %v3076_v5  ;;  %v3422_v36 = vpop.f32.mrf.mxu0 }
 0x4d1   :  { %v3166_v63 = vpop.f32.mrf.mxu1 }
 0x4d2   :  { %v3167_v28 = vadd.f32 %v3166_v63, %v3078_v47  ;;  %v3247_v51 = vadd.f32 %v3246_v45, %v3165_v34  ;;  %v3424_v32 = vpop.f32.mrf.mxu0 }
 0x4d4   :  { %v3249_v14 = vadd.f32 %v3248_v15, %v3167_v28 }
 0x4d8   :  { %v3342_v1 = vpop.f32.mrf.mxu1 }
 0x4d9   :  { %v3343_v8 = vadd.f32 %v3342_v1, %v3247_v51  ;;  %v6258_v1 = vld [vmem:[#allocation54_spill] sm:$0xff] }
 0x4da   :  { %v3344_v17 = vpop.f32.mrf.mxu1 }
 0x4db   :  { %v3423_v22 = vadd.f32 %v3422_v36, %v3343_v8  ;;  %v3345_v57 = vadd.f32 %v3344_v17, %v3249_v14  ;;  %v6259_v8 = vld [vmem:[#allocation57_spill] sm:$0xff] }
 0x4dd   :  { %v3429_v61 = vsub.f32 %v3423_v22, %v3427_v19  ;;  %v3425_v24 = vadd.f32 %v3424_v32, %v3345_v57 }
 0x4df   :  { %v3433_v58 = vadd.f32 1e-05, %v3429_v61  ;;  %v3430_v25 = vsub.f32 %v3425_v24, %v3428_v42 }
 0x4e1   :  { %v3434_v9 = vadd.f32 1e-05, %v3430_v25  ;;  %4335 = vrsqrt.f32 %v3433_v58  ;;  %v3773_v25 = vld [vmem:[%s5848_s4 + $0x3] ss:$0 sm:$0xff] }
 0x4e3   :  { %4337 = vrsqrt.f32 %v3434_v9 }
 0x4ee   :  { %v4336_v49 = vpop.eup %4335 }
 0x4f0   :  { %v4338_v44 = vpop.eup %4337 }
 0x4f1   :  { %v3439_v7 = vcombine.low %v4336_v49, %v4338_v44 }
 0x4f3   :  { %v3446_v13 = vrot.slane %v3439_v7, %v3445_v62 }
 0x4f5   :  { %v3453_v33 = vrot.slane %v3446_v13, %v3445_v62 }
 0x4f7   :  { %v3455_v40 = vmul.f32 %v3771_v31, %v3453_v33 }
 0x4f9   :  { %v3462_v46 = vrot.slane %v3455_v40, %v6250_v38  ;;  %v3466_v50 = vrot.slane %v3455_v40, %v6251_v56 }
 0x4fb   :  { %v3469_v52 = vmul.f32 %v3462_v46, %v2877_v35  ;;  %v3470_v54 = vmul.f32 %v3466_v50, %v2879_v6  ;;  %v3491_v43 = vmul.f32 %v3466_v50, %v6252_v12  ;;  %v3493_v26 = vmul.f32 %v3466_v50, %v6253_v11 }
 0x4fc   :  { %v3490_v39 = vmul.f32 %v3462_v46, %v6254_v4  ;;  %v3492_v60 = vmul.f32 %v3462_v46, %v6255_v18  ;;  %v3495_v55 = vmul.f32 %v3466_v50, %v6256_v37  ;;  %v3497_v5 = vmul.f32 %v3466_v50, %v6257_v30 }
 0x4fd   :  { %v3473_v21 = vcombine.low %v3469_v52, %v3470_v54  ;;  %v3494_v6 = vmul.f32 %v3462_v46, %v6258_v1  ;;  %v3496_v14 = vmul.f32 %v3462_v46, %v6259_v8 }
 0x4ff   :  { %v3480_v59 = vrot.slane %v3473_v21, %v3445_v62 }
 0x501   :  { %v3487_v27 = vrot.slane %v3480_v59, %v3445_v62 }
 0x503   :  { %v3489_v0 = vsub.f32 %v3772_v20, %v3487_v27 }
 0x505   :  { %v3506_v41 = vrot.slane %v3489_v0, %v6251_v56  ;;  %v3502_v2 = vrot.slane %v3489_v0, %v6250_v38 }
 0x507   :  { %v3510_v45 = vadd.f32 %v3506_v41, %v3491_v43  ;;  %v3512_v63 = vadd.f32 %v3506_v41, %v3493_v26  ;;  %v3509_v3 = vadd.f32 %v3502_v2, %v3490_v39  ;;  %v3511_v47 = vadd.f32 %v3502_v2, %v3492_v60 }
 0x508   :  { %v3514_v34 = vadd.f32 %v3506_v41, %v3495_v55  ;;  %v3516_v10 = vadd.f32 %v3506_v41, %v3497_v5  ;;  %v3513_v22 = vadd.f32 %v3502_v2, %v3494_v6  ;;  %v3515_v57 = vadd.f32 %v3502_v2, %v3496_v14 }
 0x509   :  { %v3518_v28 = vmax.f32 %v3510_v45, 0.0  ;;  %v3520_v15 = vmax.f32 %v3512_v63, 0.0  ;;  %v3517_v35 = vmax.f32 %v3509_v3, 0.0  ;;  %v3519_v23 = vmax.f32 %v3511_v47, 0.0 }
 0x50a   :  { %v3522_v51 = vmax.f32 %v3514_v34, 0.0  ;;  %v3524_v36 = vmax.f32 %v3516_v10, 0.0  ;;  %v3521_v42 = vmax.f32 %v3513_v22, 0.0  ;;  %v3523_v61 = vmax.f32 %v3515_v57, 0.0 }
 0x50b   :  { %v3526_v17 = vpack.c.bf16 %v3520_v15, %v3518_v28  ;;  %v3525_v19 = vpack.c.bf16 %v3519_v23, %v3517_v35 }
 0x50c   :  { %v3528_v32 = vpack.c.bf16 %v3524_v36, %v3522_v51  ;;  %v3527_v24 = vpack.c.bf16 %v3523_v61, %v3521_v42 }
 0x50d   :  { %3694 = vmatprep.mubr.bf16.mxu1 %v3526_v17 }
 0x50e   :  { %3695 = vmatmul.mubr.bf16.vlgmr.msra.gmra.mxu1 %v3525_v19 }
 0x50f   :  { %3702 = vmatprep.mubr.bf16.mxu1 %v3528_v32 }
 0x516   :  { %3703 = vmatmul.mubr.bf16.gmra.mxu1 %v3527_v24 }
 0x5ce   :  { %v4226_v58 = vpop.f32.mrf.mxu1 }
 0x5d0   :  { %v4227_v9 = vpop.f32.mrf.mxu1 }
 0x5d1   :  { %v4228_v53 = vadd.f32 %v4227_v9, %v4226_v58 }
 0x5d2   :  { %v4229_v16 = vpop.f32.mrf.mxu1 }
 0x5d3   :  { %v3697_v29 = vadd.f32 %v4228_v53, %v3773_v25 }
 0x5d4   :  { %v4230_v49 = vpop.f32.mrf.mxu1 }
 0x5d5   :  { %v3711_v48 = vmax.f32 %v3697_v29, 0.0  ;;  %v4231_v62 = vadd.f32 %v4230_v49, %v4229_v16 }
 0x5d6   :  { %v4232_v44 = vpop.f32.mrf.mxu1 }
 0x5d7   :  { %3715 = vst [vmem:[%s5851_s7] sm:$0xff] %v3711_v48  ;;  %v3700_v7 = vadd.f32 %v4231_v62, %v3773_v25 }
 0x5d8   :  { %v4233_v13 = vpop.f32.mrf.mxu1 }
 0x5d9   :  { %v3712_v31 = vmax.f32 %v3700_v7, 0.0  ;;  %v4234_v33 = vadd.f32 %v4233_v13, %v4232_v44 }
 0x5da   :  { %v4235_v40 = vpop.f32.mrf.mxu1 }
 0x5db   :  { %3716 = vst [vmem:[%s5851_s7 + $0x8] sm:$0xff] %v3712_v31  ;;  %v3705_v38 = vadd.f32 %v4234_v33, %v3773_v25 }
 0x5dc   :  { %v4236_v46 = vpop.f32.mrf.mxu1 }
 0x5dd   :  { %v3713_v56 = vmax.f32 %v3705_v38, 0.0  ;;  %v4237_v50 = vadd.f32 %v4236_v46, %v4235_v40 }
 0x5df   :  { %3717 = vst [vmem:[%s5851_s7 + $0x10] sm:$0xff] %v3713_v56  ;;  %v3708_v52 = vadd.f32 %v4237_v50, %v3773_v25 }
 0x5e1   :  { %v3714_v54 = vmax.f32 %v3708_v52, 0.0 }
 0x5e3   :  { %3718 = vst [vmem:[%s5851_s7 + $0x18] sm:$0xff] %v3714_v54 }
 0x5e4   :  { %3723 = vsyncpa [#allocation3], 1 }
 0x5e5   :  { %3724 = vsyncpa [#allocation5], 1 }

</bundles_post_ra>
